<compile_context>
chip_gen: v5e
topology: v5e:2x2
jax: 0.10.0
libtpu: 0.0.40
codegen_flags: <defaults>
</compile_context>

<pallas_src>
import jax
import jax.numpy as jnp
from jax.experimental import pallas as pl
from jax.experimental.pallas import tpu as pltpu

# ---------------- module hyperparameters (small, consistent shapes) ----------
SEQUENCE_LENGTH = 8            # global `sequence_length` in the original file
PROCESSING_PARAMS_SIZE = 8     # global `processing_params_size`
INPUT_SIZE = 8                 # must equal PROCESSING_PARAMS_SIZE for the
                               # original cat/LSTM shapes to be consistent
HIDDEN_SIZE = 32
NUM_LAYERS = 2                 # fused kernel below is written for exactly 2
DROPOUT = 0.0                  # nn.LSTM dropout is inactive in eval mode anyway
BATCH = 2
N_DEC_STEPS = 11 - SEQUENCE_LENGTH            # 3
X_DIM = INPUT_SIZE * (SEQUENCE_LENGTH + 1)    # 72

assert NUM_LAYERS == 2, "fused kernel is specialized to num_layers == 2"
assert INPUT_SIZE == PROCESSING_PARAMS_SIZE
assert 4 * HIDDEN_SIZE == 128, "gate width must fill one 128-lane vreg"

G = 4 * HIDDEN_SIZE            # 128 gate lanes
DATA_WIDTH = 128               # fused data vector, lane-padded:
                               #   [0:72) x, [72:80) pp, [80:88) target0, rest 0

# ---- weight-slab row layout (all segment starts are multiples of 8) ---------
ROW_ENC0_W   = 0                                            # (128, 128)
ROW_ENC1_W   = ROW_ENC0_W + DATA_WIDTH                      # 128  (32, 128)
ROW_DEC0_W   = ROW_ENC1_W + HIDDEN_SIZE                     # 160  (40, 128)
ROW_DEC0_EMB = ROW_DEC0_W + INPUT_SIZE + HIDDEN_SIZE        # 200  ( 8, 128)
ROW_DEC1_W   = ROW_DEC0_EMB + PROCESSING_PARAMS_SIZE        # 208  (64, 128)
ROW_OUT_W    = ROW_DEC1_W + 2 * HIDDEN_SIZE                 # 272  (32, 128)
ROW_MISC     = ROW_OUT_W + HIDDEN_SIZE                      # 304  ( 8, 128)
SLAB_ROWS    = ROW_MISC + 8                                 # 312
# misc rows: 0 enc0_b, 1 enc1_b, 2 dec0_b(+emb fold), 3 dec1_b, 4 out_b, 5 q


# ---------------------------- fused Pallas kernel ----------------------------
def _fused_forward_kernel(data_ref, slab_ref, out_ref):
    """EncoderDecoderRNN.forward (iftrain=False) in one kernel invocation.

    data_ref : (B, 128)  fused [x | pp | target0 | 0-pad] input
    slab_ref : (312, 128) packed weights/biases/q (see ROW_* layout)
    out_ref  : (8, 128)  rows 0:B   lanes 0:24  -> output_seq (B, 3, 8)
                         rows B:2B  lanes 0:32  -> h layer0,  lanes 32:64 -> c layer0
                         rows 2B:3B lanes 0:32  -> h layer1,  lanes 32:64 -> c layer1
    """
    f32 = jnp.float32
    H = HIDDEN_SIZE
    B = data_ref.shape[0]

    def dot(a, b):
        return jnp.dot(a, b, preferred_element_type=f32)

    # Hoisted lane mask selecting the cell-candidate (g) gate block, lanes [2H,3H).
    lane = jax.lax.broadcasted_iota(jnp.int32, (B, G), dimension=1)
    is_g = (lane >= 2 * H) & (lane < 3 * H)

    def lstm_cell(gates, c_prev):
        # PyTorch gate order: i, f, g, o.  Single EUP sigmoid pass over all
        # 4H lanes; the g block uses tanh(x) = 2*sigmoid(2x) - 1.
        act = jax.nn.sigmoid(jnp.where(is_g, 2.0 * gates, gates))
        act = jnp.where(is_g, 2.0 * act - 1.0, act)
        i = act[:, 0 * H:1 * H]
        f = act[:, 1 * H:2 * H]
        g = act[:, 2 * H:3 * H]
        o = act[:, 3 * H:4 * H]
        c_new = f * c_prev + i * g
        h_new = o * jnp.tanh(c_new)
        return h_new, c_new

    # ---- load inputs / weight views (static slab slices, all 8-row aligned) --
    data = data_ref[...]                                              # (B, 128)
    pp   = data[:, X_DIM:X_DIM + PROCESSING_PARAMS_SIZE]              # (B, 8)
    tgt0 = data[:, X_DIM + PROCESSING_PARAMS_SIZE:
                   X_DIM + 2 * PROCESSING_PARAMS_SIZE]                # (B, 8)

    enc0_w  = slab_ref[ROW_ENC0_W:ROW_ENC0_W + DATA_WIDTH, :]         # (128, 128)
    enc1_w  = slab_ref[ROW_ENC1_W:ROW_ENC1_W + H, :]                  # (32, 128)
    dec0_w  = slab_ref[ROW_DEC0_W:ROW_DEC0_W + INPUT_SIZE + H, :]     # (40, 128)
    dec0_we = slab_ref[ROW_DEC0_EMB:ROW_DEC0_EMB + PROCESSING_PARAMS_SIZE, :]
    dec1_w  = slab_ref[ROW_DEC1_W:ROW_DEC1_W + 2 * H, :]              # (64, 128)
    out_w   = slab_ref[ROW_OUT_W:ROW_OUT_W + H, :]                    # (32, 128)
    enc0_b  = slab_ref[ROW_MISC + 0:ROW_MISC + 1, :]
    enc1_b  = slab_ref[ROW_MISC + 1:ROW_MISC + 2, :]
    dec0_b  = slab_ref[ROW_MISC + 2:ROW_MISC + 3, :]
    dec1_b  = slab_ref[ROW_MISC + 3:ROW_MISC + 4, :]
    out_b   = slab_ref[ROW_MISC + 4:ROW_MISC + 5, :]
    q       = slab_ref[ROW_MISC + 5:ROW_MISC + 6, :]

    # Deterministic padding in the single output buffer.
    out_ref[...] = jnp.zeros_like(out_ref)

    # ---------------- encoder: one timestep, zero initial (h, c) -------------
    # h0 == c0 == 0  =>  the W_hh @ h terms are exactly zero and omitted.
    zeros_c = jnp.zeros((B, H), f32)
    h0, c0 = lstm_cell(dot(data, enc0_w) + enc0_b, zeros_c)   # layer 0
    h1, c1 = lstm_cell(dot(h0, enc1_w) + enc1_b, zeros_c)     # layer 1

    # ---------------- decoder: hidden initialized from encoder ---------------
    # Loop-invariant contribution of the (folded) params embedding (+bias) to
    # the decoder layer-0 gates, hoisted out of the step loop.
    emb_gates = dot(pp, dec0_we) + dec0_b

    prev = tgt0                               # target[:, 0, :]
    for step in range(N_DEC_STEPS):           # unrolled: recurrence is serial
        # layer 0: single stacked matmul over [prev | h0]
        g_d0 = dot(jnp.concatenate([prev, h0], axis=-1), dec0_w) + emb_gates
        h0, c0 = lstm_cell(g_d0, c0)
        # layer 1: single stacked matmul over [h0 | h1]
        g_d1 = dot(jnp.concatenate([h0, h1], axis=-1), dec1_w) + dec1_b
        h1, c1 = lstm_cell(g_d1, c1)

        # output Linear fused with constrain(): relu, normalize by q.odf.
        # out_w / out_b / q have zeros in lanes >= 8, so lanes >= 8 of y are 0.
        y = dot(h1, out_w) + out_b
        odf = jnp.maximum(y, 0.0)
        volfrac = jnp.sum(odf * q, axis=-1, keepdims=True)
        # TODO(synk): PyTorch constrain() divides with no zero-guard (NaN/Inf if a
        #             whole row is <= 0); semantics kept (approx reciprocal on EUP).
        out = odf * pl.reciprocal(volfrac, approx=True)
        out8 = out[:, :INPUT_SIZE]
        out_ref[0:B, step * INPUT_SIZE:(step + 1) * INPUT_SIZE] = out8
        prev = out8                           # next decoder input = [out, params_emb]

    # final decoder hidden state (static sublane/lane slice stores)
    out_ref[B:2 * B, 0:H] = h0
    out_ref[B:2 * B, H:2 * H] = c0
    out_ref[2 * B:3 * B, 0:H] = h1
    out_ref[2 * B:3 * B, H:2 * H] = c1


_VMEM = pl.BlockSpec(memory_space=pltpu.MemorySpace.VMEM)


@jax.jit
def encoder_decoder_rnn_forward(slab, x, processing_params, target):
    """iftrain=False branch of EncoderDecoderRNN.forward — one pallas_call."""
    B = x.shape[0]
    # Fuse the three data inputs into one lane-padded (B, 128) array -> 1 DMA.
    data = jnp.concatenate([x, processing_params, target[:, 0, :]], axis=-1)
    data = jnp.pad(data, ((0, 0), (0, DATA_WIDTH - data.shape[1])))

    out_rows = ((3 * B + 7) // 8) * 8
    buf = pl.pallas_call(
        _fused_forward_kernel,
        out_shape=jax.ShapeDtypeStruct((out_rows, G), jnp.float32),
        in_specs=[_VMEM, _VMEM],
        out_specs=_VMEM,
    )(data, slab)

    H = HIDDEN_SIZE
    output_seq = buf[:B, :N_DEC_STEPS * INPUT_SIZE].reshape(B, N_DEC_STEPS, INPUT_SIZE)
    dec_h = jnp.stack([buf[B:2 * B, 0:H], buf[2 * B:3 * B, 0:H]], axis=0)
    dec_c = jnp.stack([buf[B:2 * B, H:2 * H], buf[2 * B:3 * B, H:2 * H]], axis=0)
    return output_seq, (dec_h, dec_c)


# --------------------------- parameter setup --------------------------------
def _uniform(key, shape, bound):
    return jax.random.uniform(key, shape, jnp.float32, -bound, bound)


def init_params(key):
    """PyTorch-default-style init, pre-packed into the kernel-ready weight slab.

    All transposes, b_ih+b_hh fusion, param_embedding folding, gate-weight
    stacking and lane padding happen here once, never per call.
    """
    H = HIDDEN_SIZE
    enc_in = X_DIM + PROCESSING_PARAMS_SIZE      # 80
    dec_in = INPUT_SIZE * 2                      # 16
    k = 1.0 / jnp.sqrt(H)
    keys = iter(jax.random.split(key, 32))

    def lstm_layer(in_dim):
        w_ih = _uniform(next(keys), (4 * H, in_dim), k)
        w_hh = _uniform(next(keys), (4 * H, H), k)
        b_ih = _uniform(next(keys), (4 * H,), k)
        b_hh = _uniform(next(keys), (4 * H,), k)
        # pre-transpose weights, fuse biases (done once at init)
        return w_ih.T, w_hh.T, (b_ih + b_hh).reshape(1, -1)

    enc0_wih, _enc0_whh, enc0_b = lstm_layer(enc_in)   # W_hh unused: h0 == 0
    enc1_wih, _enc1_whh, enc1_b = lstm_layer(H)
    dec0_wih, dec0_whh, dec0_b = lstm_layer(dec_in)
    dec1_wih, dec1_whh, dec1_b = lstm_layer(H)

    ke = 1.0 / jnp.sqrt(PROCESSING_PARAMS_SIZE)
    ko = 1.0 / jnp.sqrt(H)
    emb_w_t = _uniform(next(keys), (INPUT_SIZE, PROCESSING_PARAMS_SIZE), ke).T  # (PP, IN)
    emb_b = _uniform(next(keys), (INPUT_SIZE,), ke).reshape(1, -1)              # (1, IN)
    out_w_t = _uniform(next(keys), (INPUT_SIZE, H), ko).T                       # (H, IN)
    out_b = _uniform(next(keys), (INPUT_SIZE,), ko).reshape(1, -1)              # (1, IN)

    # synthetic deterministic volume-fraction vector for constrain()
    q = (jnp.linspace(0.5, 1.5, INPUT_SIZE, dtype=jnp.float32) / INPUT_SIZE).reshape(1, -1)

    # ---- fold param_embedding through encoder-0 / decoder-0 gate weights ----
    enc0_wx = enc0_wih[:X_DIM, :]                       # (72, 128)
    enc0_we = enc0_wih[X_DIM:, :]                       # (8, 128)
    enc0_we_fold = emb_w_t @ enc0_we                    # (8, 128)
    enc0_b_fold = enc0_b + emb_b @ enc0_we              # (1, 128)

    dec0_wprev = dec0_wih[:INPUT_SIZE, :]               # (8, 128)
    dec0_wemb = dec0_wih[INPUT_SIZE:, :]                # (8, 128)
    dec0_wemb_fold = emb_w_t @ dec0_wemb                # (8, 128)
    dec0_b_fold = dec0_b + emb_b @ dec0_wemb            # (1, 128)

    # encoder layer-0 weight over the padded (B, 128) fused data vector
    # (rows 80:128 are zero so target0 / padding lanes contribute nothing)
    enc0_w = jnp.zeros((DATA_WIDTH, G), jnp.float32)
    enc0_w = enc0_w.at[:X_DIM, :].set(enc0_wx)
    enc0_w = enc0_w.at[X_DIM:X_DIM + PROCESSING_PARAMS_SIZE, :].set(enc0_we_fold)

    # stacked decoder gate weights: one MXU push per layer per step
    dec0_w = jnp.concatenate([dec0_wprev, dec0_whh], axis=0)   # (40, 128)
    dec1_w = jnp.concatenate([dec1_wih, dec1_whh], axis=0)     # (64, 128)

    out_w_pad = jnp.pad(out_w_t, ((0, 0), (0, G - INPUT_SIZE)))  # (32, 128)

    misc = jnp.zeros((8, G), jnp.float32)
    misc = misc.at[0].set(enc0_b_fold[0])
    misc = misc.at[1].set(enc1_b[0])
    misc = misc.at[2].set(dec0_b_fold[0])
    misc = misc.at[3].set(dec1_b[0])
    misc = misc.at[4, :INPUT_SIZE].set(out_b[0])
    misc = misc.at[5, :INPUT_SIZE].set(q[0])

    slab = jnp.concatenate(
        [enc0_w, enc1_wih, dec0_w, dec0_wemb_fold, dec1_w, out_w_pad, misc], axis=0)
    assert slab.shape == (SLAB_ROWS, G)
    return slab


# --------------------------------- main --------------------------------------
if __name__ == "__main__":
    key = jax.random.PRNGKey(0)
    k_param, k_x, k_pp, k_tgt = jax.random.split(key, 4)

    slab = init_params(k_param)

    x = jax.random.normal(k_x, (BATCH, X_DIM), jnp.float32)
    processing_params = jax.random.normal(
        k_pp, (BATCH, PROCESSING_PARAMS_SIZE), jnp.float32)
    target = jax.random.normal(
        k_tgt, (BATCH, N_DEC_STEPS, INPUT_SIZE), jnp.float32)

    output_seq, (dec_h, dec_c) = encoder_decoder_rnn_forward(
        slab, x, processing_params, target)
    jax.block_until_ready((output_seq, dec_h, dec_c))

    assert output_seq.shape == (BATCH, N_DEC_STEPS, INPUT_SIZE)
    assert dec_h.shape == (NUM_LAYERS, BATCH, HIDDEN_SIZE)
    assert dec_c.shape == (NUM_LAYERS, BATCH, HIDDEN_SIZE)
    print("KERNEL_OK")
</pallas_src>

<mosaic_0001>
module attributes {stable_mosaic.version = 11 : i64} {
  func.func @_fused_forward_kernel(%arg0: memref<2x128xf32, #tpu.memory_space<vmem>>, %arg1: memref<312x128xf32, #tpu.memory_space<vmem>>, %arg2: memref<8x128xf32, #tpu.memory_space<vmem>>) attributes {dimension_semantics = [], scalar_prefetch = 0 : i64, scratch_operands = 0 : i64, tpu.core_type = #tpu.core_type<tc>} {
    %0 = tpu.iota {dimensions = array<i32: 1>} : vector<2x128xi32>
    %c64_i32 = arith.constant 64 : i32
    %1 = vector.broadcast %c64_i32 : i32 to vector<2x128xi32>
    %2 = arith.cmpi sge, %0, %1 : vector<2x128xi32>
    %c96_i32 = arith.constant 96 : i32
    %3 = vector.broadcast %c96_i32 : i32 to vector<2x128xi32>
    %4 = arith.cmpi slt, %0, %3 : vector<2x128xi32>
    %5 = arith.andi %2, %4 : vector<2x128xi1>
    %c0 = arith.constant 0 : index
    %c0_0 = arith.constant 0 : index
    %6 = vector.load %arg0[%c0, %c0_0] : memref<2x128xf32, #tpu.memory_space<vmem>>, vector<2x128xf32>
    %7 = vector.extract_strided_slice %6 {offsets = [0, 72], sizes = [2, 8], strides = [1, 1]} : vector<2x128xf32> to vector<2x8xf32>
    %8 = vector.extract_strided_slice %6 {offsets = [0, 80], sizes = [2, 8], strides = [1, 1]} : vector<2x128xf32> to vector<2x8xf32>
    %c0_1 = arith.constant 0 : index
    %c0_2 = arith.constant 0 : index
    %9 = vector.load %arg1[%c0_1, %c0_2] : memref<312x128xf32, #tpu.memory_space<vmem>>, vector<128x128xf32>
    %c128 = arith.constant 128 : index
    %c0_3 = arith.constant 0 : index
    %10 = vector.load %arg1[%c128, %c0_3] : memref<312x128xf32, #tpu.memory_space<vmem>>, vector<32x128xf32>
    %c160 = arith.constant 160 : index
    %c0_4 = arith.constant 0 : index
    %11 = vector.load %arg1[%c160, %c0_4] : memref<312x128xf32, #tpu.memory_space<vmem>>, vector<40x128xf32>
    %c200 = arith.constant 200 : index
    %c0_5 = arith.constant 0 : index
    %12 = vector.load %arg1[%c200, %c0_5] : memref<312x128xf32, #tpu.memory_space<vmem>>, vector<8x128xf32>
    %c208 = arith.constant 208 : index
    %c0_6 = arith.constant 0 : index
    %13 = vector.load %arg1[%c208, %c0_6] : memref<312x128xf32, #tpu.memory_space<vmem>>, vector<64x128xf32>
    %c272 = arith.constant 272 : index
    %c0_7 = arith.constant 0 : index
    %14 = vector.load %arg1[%c272, %c0_7] : memref<312x128xf32, #tpu.memory_space<vmem>>, vector<32x128xf32>
    %c304 = arith.constant 304 : index
    %c0_8 = arith.constant 0 : index
    %15 = vector.load %arg1[%c304, %c0_8] : memref<312x128xf32, #tpu.memory_space<vmem>>, vector<1x128xf32>
    %c305 = arith.constant 305 : index
    %c0_9 = arith.constant 0 : index
    %16 = vector.load %arg1[%c305, %c0_9] : memref<312x128xf32, #tpu.memory_space<vmem>>, vector<1x128xf32>
    %c306 = arith.constant 306 : index
    %c0_10 = arith.constant 0 : index
    %17 = vector.load %arg1[%c306, %c0_10] : memref<312x128xf32, #tpu.memory_space<vmem>>, vector<1x128xf32>
    %c307 = arith.constant 307 : index
    %c0_11 = arith.constant 0 : index
    %18 = vector.load %arg1[%c307, %c0_11] : memref<312x128xf32, #tpu.memory_space<vmem>>, vector<1x128xf32>
    %c308 = arith.constant 308 : index
    %c0_12 = arith.constant 0 : index
    %19 = vector.load %arg1[%c308, %c0_12] : memref<312x128xf32, #tpu.memory_space<vmem>>, vector<1x128xf32>
    %c309 = arith.constant 309 : index
    %c0_13 = arith.constant 0 : index
    %20 = vector.load %arg1[%c309, %c0_13] : memref<312x128xf32, #tpu.memory_space<vmem>>, vector<1x128xf32>
    %cst = arith.constant 0.000000e+00 : f32
    %21 = vector.broadcast %cst : f32 to vector<8x128xf32>
    %c0_14 = arith.constant 0 : index
    %c0_15 = arith.constant 0 : index
    %22 = vector.load %arg2[%c0_14, %c0_15] : memref<8x128xf32, #tpu.memory_space<vmem>>, vector<8x128xf32>
    tpu.vector_store %arg2[%c0_14, %c0_15], %21 {strides = array<i32>} : memref<8x128xf32, #tpu.memory_space<vmem>>, vector<8x128xf32>,
    %cst_16 = arith.constant 0.000000e+00 : f32
    %23 = vector.broadcast %cst_16 : f32 to vector<2x32xf32>
    %cst_17 = arith.constant dense<0.000000e+00> : vector<2x128xf32>
    %24 = tpu.matmul %6, %9, %cst_17 {dimension_numbers = #tpu.dot_dimension_numbers<[1], [0], [0], [1], [0, 0, 1, 1], [], []>} : vector<2x128xf32>, vector<128x128xf32>, vector<2x128xf32> -> vector<2x128xf32>
    %25 = vector.broadcast %15 : vector<1x128xf32> to vector<2x128xf32>
    %26 = arith.addf %24, %25 : vector<2x128xf32>
    %cst_18 = arith.constant 2.000000e+00 : f32
    %27 = vector.broadcast %cst_18 : f32 to vector<2x128xf32>
    %28 = arith.mulf %27, %26 : vector<2x128xf32>
    %29 = arith.select %5, %28, %26 : vector<2x128xi1>, vector<2x128xf32>
    %30 = arith.negf %29 : vector<2x128xf32>
    %31 = math.exp %30 : vector<2x128xf32>
    %cst_19 = arith.constant 1.000000e+00 : f32
    %32 = vector.broadcast %cst_19 : f32 to vector<2x128xf32>
    %33 = arith.addf %32, %31 : vector<2x128xf32>
    %34 = arith.divf %32, %33 : vector<2x128xf32>
    %cst_20 = arith.constant 2.000000e+00 : f32
    %35 = vector.broadcast %cst_20 : f32 to vector<2x128xf32>
    %36 = arith.mulf %35, %34 : vector<2x128xf32>
    %cst_21 = arith.constant 1.000000e+00 : f32
    %37 = vector.broadcast %cst_21 : f32 to vector<2x128xf32>
    %38 = arith.subf %36, %37 : vector<2x128xf32>
    %39 = arith.select %5, %38, %34 : vector<2x128xi1>, vector<2x128xf32>
    %40 = vector.extract_strided_slice %39 {offsets = [0, 0], sizes = [2, 32], strides = [1, 1]} : vector<2x128xf32> to vector<2x32xf32>
    %41 = vector.extract_strided_slice %39 {offsets = [0, 32], sizes = [2, 32], strides = [1, 1]} : vector<2x128xf32> to vector<2x32xf32>
    %42 = vector.extract_strided_slice %39 {offsets = [0, 64], sizes = [2, 32], strides = [1, 1]} : vector<2x128xf32> to vector<2x32xf32>
    %43 = vector.extract_strided_slice %39 {offsets = [0, 96], sizes = [2, 32], strides = [1, 1]} : vector<2x128xf32> to vector<2x32xf32>
    %44 = arith.mulf %41, %23 : vector<2x32xf32>
    %45 = arith.mulf %40, %42 : vector<2x32xf32>
    %46 = arith.addf %44, %45 : vector<2x32xf32>
    %47 = math.tanh %46 : vector<2x32xf32>
    %48 = arith.mulf %43, %47 : vector<2x32xf32>
    %cst_22 = arith.constant dense<0.000000e+00> : vector<2x128xf32>
    %49 = tpu.matmul %48, %10, %cst_22 {dimension_numbers = #tpu.dot_dimension_numbers<[1], [0], [0], [1], [0, 0, 1, 1], [], []>} : vector<2x32xf32>, vector<32x128xf32>, vector<2x128xf32> -> vector<2x128xf32>
    %50 = vector.broadcast %16 : vector<1x128xf32> to vector<2x128xf32>
    %51 = arith.addf %49, %50 : vector<2x128xf32>
    %cst_23 = arith.constant 2.000000e+00 : f32
    %52 = vector.broadcast %cst_23 : f32 to vector<2x128xf32>
    %53 = arith.mulf %52, %51 : vector<2x128xf32>
    %54 = arith.select %5, %53, %51 : vector<2x128xi1>, vector<2x128xf32>
    %55 = arith.negf %54 : vector<2x128xf32>
    %56 = math.exp %55 : vector<2x128xf32>
    %cst_24 = arith.constant 1.000000e+00 : f32
    %57 = vector.broadcast %cst_24 : f32 to vector<2x128xf32>
    %58 = arith.addf %57, %56 : vector<2x128xf32>
    %59 = arith.divf %57, %58 : vector<2x128xf32>
    %cst_25 = arith.constant 2.000000e+00 : f32
    %60 = vector.broadcast %cst_25 : f32 to vector<2x128xf32>
    %61 = arith.mulf %60, %59 : vector<2x128xf32>
    %cst_26 = arith.constant 1.000000e+00 : f32
    %62 = vector.broadcast %cst_26 : f32 to vector<2x128xf32>
    %63 = arith.subf %61, %62 : vector<2x128xf32>
    %64 = arith.select %5, %63, %59 : vector<2x128xi1>, vector<2x128xf32>
    %65 = vector.extract_strided_slice %64 {offsets = [0, 0], sizes = [2, 32], strides = [1, 1]} : vector<2x128xf32> to vector<2x32xf32>
    %66 = vector.extract_strided_slice %64 {offsets = [0, 32], sizes = [2, 32], strides = [1, 1]} : vector<2x128xf32> to vector<2x32xf32>
    %67 = vector.extract_strided_slice %64 {offsets = [0, 64], sizes = [2, 32], strides = [1, 1]} : vector<2x128xf32> to vector<2x32xf32>
    %68 = vector.extract_strided_slice %64 {offsets = [0, 96], sizes = [2, 32], strides = [1, 1]} : vector<2x128xf32> to vector<2x32xf32>
    %69 = arith.mulf %66, %23 : vector<2x32xf32>
    %70 = arith.mulf %65, %67 : vector<2x32xf32>
    %71 = arith.addf %69, %70 : vector<2x32xf32>
    %72 = math.tanh %71 : vector<2x32xf32>
    %73 = arith.mulf %68, %72 : vector<2x32xf32>
    %cst_27 = arith.constant dense<0.000000e+00> : vector<2x128xf32>
    %74 = tpu.matmul %7, %12, %cst_27 {dimension_numbers = #tpu.dot_dimension_numbers<[1], [0], [0], [1], [0, 0, 1, 1], [], []>} : vector<2x8xf32>, vector<8x128xf32>, vector<2x128xf32> -> vector<2x128xf32>
    %75 = vector.broadcast %17 : vector<1x128xf32> to vector<2x128xf32>
    %76 = arith.addf %74, %75 : vector<2x128xf32>
    %77 = tpu.concatenate %8, %48 in 1 : vector<2x8xf32>, vector<2x32xf32> -> vector<2x40xf32>
    %cst_28 = arith.constant dense<0.000000e+00> : vector<2x128xf32>
    %78 = tpu.matmul %77, %11, %cst_28 {dimension_numbers = #tpu.dot_dimension_numbers<[1], [0], [0], [1], [0, 0, 1, 1], [], []>} : vector<2x40xf32>, vector<40x128xf32>, vector<2x128xf32> -> vector<2x128xf32>
    %79 = arith.addf %78, %76 : vector<2x128xf32>
    %cst_29 = arith.constant 2.000000e+00 : f32
    %80 = vector.broadcast %cst_29 : f32 to vector<2x128xf32>
    %81 = arith.mulf %80, %79 : vector<2x128xf32>
    %82 = arith.select %5, %81, %79 : vector<2x128xi1>, vector<2x128xf32>
    %83 = arith.negf %82 : vector<2x128xf32>
    %84 = math.exp %83 : vector<2x128xf32>
    %cst_30 = arith.constant 1.000000e+00 : f32
    %85 = vector.broadcast %cst_30 : f32 to vector<2x128xf32>
    %86 = arith.addf %85, %84 : vector<2x128xf32>
    %87 = arith.divf %85, %86 : vector<2x128xf32>
    %cst_31 = arith.constant 2.000000e+00 : f32
    %88 = vector.broadcast %cst_31 : f32 to vector<2x128xf32>
    %89 = arith.mulf %88, %87 : vector<2x128xf32>
    %cst_32 = arith.constant 1.000000e+00 : f32
    %90 = vector.broadcast %cst_32 : f32 to vector<2x128xf32>
    %91 = arith.subf %89, %90 : vector<2x128xf32>
    %92 = arith.select %5, %91, %87 : vector<2x128xi1>, vector<2x128xf32>
    %93 = vector.extract_strided_slice %92 {offsets = [0, 0], sizes = [2, 32], strides = [1, 1]} : vector<2x128xf32> to vector<2x32xf32>
    %94 = vector.extract_strided_slice %92 {offsets = [0, 32], sizes = [2, 32], strides = [1, 1]} : vector<2x128xf32> to vector<2x32xf32>
    %95 = vector.extract_strided_slice %92 {offsets = [0, 64], sizes = [2, 32], strides = [1, 1]} : vector<2x128xf32> to vector<2x32xf32>
    %96 = vector.extract_strided_slice %92 {offsets = [0, 96], sizes = [2, 32], strides = [1, 1]} : vector<2x128xf32> to vector<2x32xf32>
    %97 = arith.mulf %94, %46 : vector<2x32xf32>
    %98 = arith.mulf %93, %95 : vector<2x32xf32>
    %99 = arith.addf %97, %98 : vector<2x32xf32>
    %100 = math.tanh %99 : vector<2x32xf32>
    %101 = arith.mulf %96, %100 : vector<2x32xf32>
    %102 = tpu.concatenate %101, %73 in 1 : vector<2x32xf32>, vector<2x32xf32> -> vector<2x64xf32>
    %cst_33 = arith.constant dense<0.000000e+00> : vector<2x128xf32>
    %103 = tpu.matmul %102, %13, %cst_33 {dimension_numbers = #tpu.dot_dimension_numbers<[1], [0], [0], [1], [0, 0, 1, 1], [], []>} : vector<2x64xf32>, vector<64x128xf32>, vector<2x128xf32> -> vector<2x128xf32>
    %104 = vector.broadcast %18 : vector<1x128xf32> to vector<2x128xf32>
    %105 = arith.addf %103, %104 : vector<2x128xf32>
    %cst_34 = arith.constant 2.000000e+00 : f32
    %106 = vector.broadcast %cst_34 : f32 to vector<2x128xf32>
    %107 = arith.mulf %106, %105 : vector<2x128xf32>
    %108 = arith.select %5, %107, %105 : vector<2x128xi1>, vector<2x128xf32>
    %109 = arith.negf %108 : vector<2x128xf32>
    %110 = math.exp %109 : vector<2x128xf32>
    %cst_35 = arith.constant 1.000000e+00 : f32
    %111 = vector.broadcast %cst_35 : f32 to vector<2x128xf32>
    %112 = arith.addf %111, %110 : vector<2x128xf32>
    %113 = arith.divf %111, %112 : vector<2x128xf32>
    %cst_36 = arith.constant 2.000000e+00 : f32
    %114 = vector.broadcast %cst_36 : f32 to vector<2x128xf32>
    %115 = arith.mulf %114, %113 : vector<2x128xf32>
    %cst_37 = arith.constant 1.000000e+00 : f32
    %116 = vector.broadcast %cst_37 : f32 to vector<2x128xf32>
    %117 = arith.subf %115, %116 : vector<2x128xf32>
    %118 = arith.select %5, %117, %113 : vector<2x128xi1>, vector<2x128xf32>
    %119 = vector.extract_strided_slice %118 {offsets = [0, 0], sizes = [2, 32], strides = [1, 1]} : vector<2x128xf32> to vector<2x32xf32>
    %120 = vector.extract_strided_slice %118 {offsets = [0, 32], sizes = [2, 32], strides = [1, 1]} : vector<2x128xf32> to vector<2x32xf32>
    %121 = vector.extract_strided_slice %118 {offsets = [0, 64], sizes = [2, 32], strides = [1, 1]} : vector<2x128xf32> to vector<2x32xf32>
    %122 = vector.extract_strided_slice %118 {offsets = [0, 96], sizes = [2, 32], strides = [1, 1]} : vector<2x128xf32> to vector<2x32xf32>
    %123 = arith.mulf %120, %71 : vector<2x32xf32>
    %124 = arith.mulf %119, %121 : vector<2x32xf32>
    %125 = arith.addf %123, %124 : vector<2x32xf32>
    %126 = math.tanh %125 : vector<2x32xf32>
    %127 = arith.mulf %122, %126 : vector<2x32xf32>
    %cst_38 = arith.constant dense<0.000000e+00> : vector<2x128xf32>
    %128 = tpu.matmul %127, %14, %cst_38 {dimension_numbers = #tpu.dot_dimension_numbers<[1], [0], [0], [1], [0, 0, 1, 1], [], []>} : vector<2x32xf32>, vector<32x128xf32>, vector<2x128xf32> -> vector<2x128xf32>
    %129 = vector.broadcast %19 : vector<1x128xf32> to vector<2x128xf32>
    %130 = arith.addf %128, %129 : vector<2x128xf32>
    %cst_39 = arith.constant 0.000000e+00 : f32
    %131 = vector.broadcast %cst_39 : f32 to vector<2x128xf32>
    %132 = arith.maximumf %130, %131 : vector<2x128xf32>
    %133 = vector.broadcast %20 : vector<1x128xf32> to vector<2x128xf32>
    %134 = arith.mulf %132, %133 : vector<2x128xf32>
    %cst_40 = arith.constant dense<0.000000e+00> : vector<2xf32>
    %135 = vector.multi_reduction <add>, %134, %cst_40 [1] : vector<2x128xf32> to vector<2xf32>
    %136 = vector.shape_cast %135 : vector<2xf32> to vector<2x1xf32>
    %137 = tpu.reciprocal %136 {approx = true} : vector<2x1xf32> -> vector<2x1xf32>
    %138 = vector.broadcast %137 : vector<2x1xf32> to vector<2x128xf32>
    %139 = arith.mulf %132, %138 : vector<2x128xf32>
    %140 = vector.extract_strided_slice %139 {offsets = [0, 0], sizes = [2, 8], strides = [1, 1]} : vector<2x128xf32> to vector<2x8xf32>
    %c0_41 = arith.constant 0 : index
    %c0_42 = arith.constant 0 : index
    %141 = vector.load %arg2[%c0_41, %c0_42] : memref<8x128xf32, #tpu.memory_space<vmem>>, vector<2x8xf32>
    tpu.vector_store %arg2[%c0_41, %c0_42], %140 {strides = array<i32>} : memref<8x128xf32, #tpu.memory_space<vmem>>, vector<2x8xf32>,
    %142 = tpu.concatenate %140, %101 in 1 : vector<2x8xf32>, vector<2x32xf32> -> vector<2x40xf32>
    %cst_43 = arith.constant dense<0.000000e+00> : vector<2x128xf32>
    %143 = tpu.matmul %142, %11, %cst_43 {dimension_numbers = #tpu.dot_dimension_numbers<[1], [0], [0], [1], [0, 0, 1, 1], [], []>} : vector<2x40xf32>, vector<40x128xf32>, vector<2x128xf32> -> vector<2x128xf32>
    %144 = arith.addf %143, %76 : vector<2x128xf32>
    %cst_44 = arith.constant 2.000000e+00 : f32
    %145 = vector.broadcast %cst_44 : f32 to vector<2x128xf32>
    %146 = arith.mulf %145, %144 : vector<2x128xf32>
    %147 = arith.select %5, %146, %144 : vector<2x128xi1>, vector<2x128xf32>
    %148 = arith.negf %147 : vector<2x128xf32>
    %149 = math.exp %148 : vector<2x128xf32>
    %cst_45 = arith.constant 1.000000e+00 : f32
    %150 = vector.broadcast %cst_45 : f32 to vector<2x128xf32>
    %151 = arith.addf %150, %149 : vector<2x128xf32>
    %152 = arith.divf %150, %151 : vector<2x128xf32>
    %cst_46 = arith.constant 2.000000e+00 : f32
    %153 = vector.broadcast %cst_46 : f32 to vector<2x128xf32>
    %154 = arith.mulf %153, %152 : vector<2x128xf32>
    %cst_47 = arith.constant 1.000000e+00 : f32
    %155 = vector.broadcast %cst_47 : f32 to vector<2x128xf32>
    %156 = arith.subf %154, %155 : vector<2x128xf32>
    %157 = arith.select %5, %156, %152 : vector<2x128xi1>, vector<2x128xf32>
    %158 = vector.extract_strided_slice %157 {offsets = [0, 0], sizes = [2, 32], strides = [1, 1]} : vector<2x128xf32> to vector<2x32xf32>
    %159 = vector.extract_strided_slice %157 {offsets = [0, 32], sizes = [2, 32], strides = [1, 1]} : vector<2x128xf32> to vector<2x32xf32>
    %160 = vector.extract_strided_slice %157 {offsets = [0, 64], sizes = [2, 32], strides = [1, 1]} : vector<2x128xf32> to vector<2x32xf32>
    %161 = vector.extract_strided_slice %157 {offsets = [0, 96], sizes = [2, 32], strides = [1, 1]} : vector<2x128xf32> to vector<2x32xf32>
    %162 = arith.mulf %159, %99 : vector<2x32xf32>
    %163 = arith.mulf %158, %160 : vector<2x32xf32>
    %164 = arith.addf %162, %163 : vector<2x32xf32>
    %165 = math.tanh %164 : vector<2x32xf32>
    %166 = arith.mulf %161, %165 : vector<2x32xf32>
    %167 = tpu.concatenate %166, %127 in 1 : vector<2x32xf32>, vector<2x32xf32> -> vector<2x64xf32>
    %cst_48 = arith.constant dense<0.000000e+00> : vector<2x128xf32>
    %168 = tpu.matmul %167, %13, %cst_48 {dimension_numbers = #tpu.dot_dimension_numbers<[1], [0], [0], [1], [0, 0, 1, 1], [], []>} : vector<2x64xf32>, vector<64x128xf32>, vector<2x128xf32> -> vector<2x128xf32>
    %169 = vector.broadcast %18 : vector<1x128xf32> to vector<2x128xf32>
    %170 = arith.addf %168, %169 : vector<2x128xf32>
    %cst_49 = arith.constant 2.000000e+00 : f32
    %171 = vector.broadcast %cst_49 : f32 to vector<2x128xf32>
    %172 = arith.mulf %171, %170 : vector<2x128xf32>
    %173 = arith.select %5, %172, %170 : vector<2x128xi1>, vector<2x128xf32>
    %174 = arith.negf %173 : vector<2x128xf32>
    %175 = math.exp %174 : vector<2x128xf32>
    %cst_50 = arith.constant 1.000000e+00 : f32
    %176 = vector.broadcast %cst_50 : f32 to vector<2x128xf32>
    %177 = arith.addf %176, %175 : vector<2x128xf32>
    %178 = arith.divf %176, %177 : vector<2x128xf32>
    %cst_51 = arith.constant 2.000000e+00 : f32
    %179 = vector.broadcast %cst_51 : f32 to vector<2x128xf32>
    %180 = arith.mulf %179, %178 : vector<2x128xf32>
    %cst_52 = arith.constant 1.000000e+00 : f32
    %181 = vector.broadcast %cst_52 : f32 to vector<2x128xf32>
    %182 = arith.subf %180, %181 : vector<2x128xf32>
    %183 = arith.select %5, %182, %178 : vector<2x128xi1>, vector<2x128xf32>
    %184 = vector.extract_strided_slice %183 {offsets = [0, 0], sizes = [2, 32], strides = [1, 1]} : vector<2x128xf32> to vector<2x32xf32>
    %185 = vector.extract_strided_slice %183 {offsets = [0, 32], sizes = [2, 32], strides = [1, 1]} : vector<2x128xf32> to vector<2x32xf32>
    %186 = vector.extract_strided_slice %183 {offsets = [0, 64], sizes = [2, 32], strides = [1, 1]} : vector<2x128xf32> to vector<2x32xf32>
    %187 = vector.extract_strided_slice %183 {offsets = [0, 96], sizes = [2, 32], strides = [1, 1]} : vector<2x128xf32> to vector<2x32xf32>
    %188 = arith.mulf %185, %125 : vector<2x32xf32>
    %189 = arith.mulf %184, %186 : vector<2x32xf32>
    %190 = arith.addf %188, %189 : vector<2x32xf32>
    %191 = math.tanh %190 : vector<2x32xf32>
    %192 = arith.mulf %187, %191 : vector<2x32xf32>
    %cst_53 = arith.constant dense<0.000000e+00> : vector<2x128xf32>
    %193 = tpu.matmul %192, %14, %cst_53 {dimension_numbers = #tpu.dot_dimension_numbers<[1], [0], [0], [1], [0, 0, 1, 1], [], []>} : vector<2x32xf32>, vector<32x128xf32>, vector<2x128xf32> -> vector<2x128xf32>
    %194 = vector.broadcast %19 : vector<1x128xf32> to vector<2x128xf32>
    %195 = arith.addf %193, %194 : vector<2x128xf32>
    %cst_54 = arith.constant 0.000000e+00 : f32
    %196 = vector.broadcast %cst_54 : f32 to vector<2x128xf32>
    %197 = arith.maximumf %195, %196 : vector<2x128xf32>
    %198 = vector.broadcast %20 : vector<1x128xf32> to vector<2x128xf32>
    %199 = arith.mulf %197, %198 : vector<2x128xf32>
    %cst_55 = arith.constant dense<0.000000e+00> : vector<2xf32>
    %200 = vector.multi_reduction <add>, %199, %cst_55 [1] : vector<2x128xf32> to vector<2xf32>
    %201 = vector.shape_cast %200 : vector<2xf32> to vector<2x1xf32>
    %202 = tpu.reciprocal %201 {approx = true} : vector<2x1xf32> -> vector<2x1xf32>
    %203 = vector.broadcast %202 : vector<2x1xf32> to vector<2x128xf32>
    %204 = arith.mulf %197, %203 : vector<2x128xf32>
    %205 = vector.extract_strided_slice %204 {offsets = [0, 0], sizes = [2, 8], strides = [1, 1]} : vector<2x128xf32> to vector<2x8xf32>
    %c0_56 = arith.constant 0 : index
    %c8 = arith.constant 8 : index
    %206 = vector.load %arg2[%c0_56, %c8] : memref<8x128xf32, #tpu.memory_space<vmem>>, vector<2x8xf32>
    tpu.vector_store %arg2[%c0_56, %c8], %205 {strides = array<i32>} : memref<8x128xf32, #tpu.memory_space<vmem>>, vector<2x8xf32>,
    %207 = tpu.concatenate %205, %166 in 1 : vector<2x8xf32>, vector<2x32xf32> -> vector<2x40xf32>
    %cst_57 = arith.constant dense<0.000000e+00> : vector<2x128xf32>
    %208 = tpu.matmul %207, %11, %cst_57 {dimension_numbers = #tpu.dot_dimension_numbers<[1], [0], [0], [1], [0, 0, 1, 1], [], []>} : vector<2x40xf32>, vector<40x128xf32>, vector<2x128xf32> -> vector<2x128xf32>
    %209 = arith.addf %208, %76 : vector<2x128xf32>
    %cst_58 = arith.constant 2.000000e+00 : f32
    %210 = vector.broadcast %cst_58 : f32 to vector<2x128xf32>
    %211 = arith.mulf %210, %209 : vector<2x128xf32>
    %212 = arith.select %5, %211, %209 : vector<2x128xi1>, vector<2x128xf32>
    %213 = arith.negf %212 : vector<2x128xf32>
    %214 = math.exp %213 : vector<2x128xf32>
    %cst_59 = arith.constant 1.000000e+00 : f32
    %215 = vector.broadcast %cst_59 : f32 to vector<2x128xf32>
    %216 = arith.addf %215, %214 : vector<2x128xf32>
    %217 = arith.divf %215, %216 : vector<2x128xf32>
    %cst_60 = arith.constant 2.000000e+00 : f32
    %218 = vector.broadcast %cst_60 : f32 to vector<2x128xf32>
    %219 = arith.mulf %218, %217 : vector<2x128xf32>
    %cst_61 = arith.constant 1.000000e+00 : f32
    %220 = vector.broadcast %cst_61 : f32 to vector<2x128xf32>
    %221 = arith.subf %219, %220 : vector<2x128xf32>
    %222 = arith.select %5, %221, %217 : vector<2x128xi1>, vector<2x128xf32>
    %223 = vector.extract_strided_slice %222 {offsets = [0, 0], sizes = [2, 32], strides = [1, 1]} : vector<2x128xf32> to vector<2x32xf32>
    %224 = vector.extract_strided_slice %222 {offsets = [0, 32], sizes = [2, 32], strides = [1, 1]} : vector<2x128xf32> to vector<2x32xf32>
    %225 = vector.extract_strided_slice %222 {offsets = [0, 64], sizes = [2, 32], strides = [1, 1]} : vector<2x128xf32> to vector<2x32xf32>
    %226 = vector.extract_strided_slice %222 {offsets = [0, 96], sizes = [2, 32], strides = [1, 1]} : vector<2x128xf32> to vector<2x32xf32>
    %227 = arith.mulf %224, %164 : vector<2x32xf32>
    %228 = arith.mulf %223, %225 : vector<2x32xf32>
    %229 = arith.addf %227, %228 : vector<2x32xf32>
    %230 = math.tanh %229 : vector<2x32xf32>
    %231 = arith.mulf %226, %230 : vector<2x32xf32>
    %232 = tpu.concatenate %231, %192 in 1 : vector<2x32xf32>, vector<2x32xf32> -> vector<2x64xf32>
    %cst_62 = arith.constant dense<0.000000e+00> : vector<2x128xf32>
    %233 = tpu.matmul %232, %13, %cst_62 {dimension_numbers = #tpu.dot_dimension_numbers<[1], [0], [0], [1], [0, 0, 1, 1], [], []>} : vector<2x64xf32>, vector<64x128xf32>, vector<2x128xf32> -> vector<2x128xf32>
    %234 = vector.broadcast %18 : vector<1x128xf32> to vector<2x128xf32>
    %235 = arith.addf %233, %234 : vector<2x128xf32>
    %cst_63 = arith.constant 2.000000e+00 : f32
    %236 = vector.broadcast %cst_63 : f32 to vector<2x128xf32>
    %237 = arith.mulf %236, %235 : vector<2x128xf32>
    %238 = arith.select %5, %237, %235 : vector<2x128xi1>, vector<2x128xf32>
    %239 = arith.negf %238 : vector<2x128xf32>
    %240 = math.exp %239 : vector<2x128xf32>
    %cst_64 = arith.constant 1.000000e+00 : f32
    %241 = vector.broadcast %cst_64 : f32 to vector<2x128xf32>
    %242 = arith.addf %241, %240 : vector<2x128xf32>
    %243 = arith.divf %241, %242 : vector<2x128xf32>
    %cst_65 = arith.constant 2.000000e+00 : f32
    %244 = vector.broadcast %cst_65 : f32 to vector<2x128xf32>
    %245 = arith.mulf %244, %243 : vector<2x128xf32>
    %cst_66 = arith.constant 1.000000e+00 : f32
    %246 = vector.broadcast %cst_66 : f32 to vector<2x128xf32>
    %247 = arith.subf %245, %246 : vector<2x128xf32>
    %248 = arith.select %5, %247, %243 : vector<2x128xi1>, vector<2x128xf32>
    %249 = vector.extract_strided_slice %248 {offsets = [0, 0], sizes = [2, 32], strides = [1, 1]} : vector<2x128xf32> to vector<2x32xf32>
    %250 = vector.extract_strided_slice %248 {offsets = [0, 32], sizes = [2, 32], strides = [1, 1]} : vector<2x128xf32> to vector<2x32xf32>
    %251 = vector.extract_strided_slice %248 {offsets = [0, 64], sizes = [2, 32], strides = [1, 1]} : vector<2x128xf32> to vector<2x32xf32>
    %252 = vector.extract_strided_slice %248 {offsets = [0, 96], sizes = [2, 32], strides = [1, 1]} : vector<2x128xf32> to vector<2x32xf32>
    %253 = arith.mulf %250, %190 : vector<2x32xf32>
    %254 = arith.mulf %249, %251 : vector<2x32xf32>
    %255 = arith.addf %253, %254 : vector<2x32xf32>
    %256 = math.tanh %255 : vector<2x32xf32>
    %257 = arith.mulf %252, %256 : vector<2x32xf32>
    %cst_67 = arith.constant dense<0.000000e+00> : vector<2x128xf32>
    %258 = tpu.matmul %257, %14, %cst_67 {dimension_numbers = #tpu.dot_dimension_numbers<[1], [0], [0], [1], [0, 0, 1, 1], [], []>} : vector<2x32xf32>, vector<32x128xf32>, vector<2x128xf32> -> vector<2x128xf32>
    %259 = vector.broadcast %19 : vector<1x128xf32> to vector<2x128xf32>
    %260 = arith.addf %258, %259 : vector<2x128xf32>
    %cst_68 = arith.constant 0.000000e+00 : f32
    %261 = vector.broadcast %cst_68 : f32 to vector<2x128xf32>
    %262 = arith.maximumf %260, %261 : vector<2x128xf32>
    %263 = vector.broadcast %20 : vector<1x128xf32> to vector<2x128xf32>
    %264 = arith.mulf %262, %263 : vector<2x128xf32>
    %cst_69 = arith.constant dense<0.000000e+00> : vector<2xf32>
    %265 = vector.multi_reduction <add>, %264, %cst_69 [1] : vector<2x128xf32> to vector<2xf32>
    %266 = vector.shape_cast %265 : vector<2xf32> to vector<2x1xf32>
    %267 = tpu.reciprocal %266 {approx = true} : vector<2x1xf32> -> vector<2x1xf32>
    %268 = vector.broadcast %267 : vector<2x1xf32> to vector<2x128xf32>
    %269 = arith.mulf %262, %268 : vector<2x128xf32>
    %270 = vector.extract_strided_slice %269 {offsets = [0, 0], sizes = [2, 8], strides = [1, 1]} : vector<2x128xf32> to vector<2x8xf32>
    %c0_70 = arith.constant 0 : index
    %c16 = arith.constant 16 : index
    %271 = vector.load %arg2[%c0_70, %c16] : memref<8x128xf32, #tpu.memory_space<vmem>>, vector<2x8xf32>
    tpu.vector_store %arg2[%c0_70, %c16], %270 {strides = array<i32>} : memref<8x128xf32, #tpu.memory_space<vmem>>, vector<2x8xf32>,
    %c2 = arith.constant 2 : index
    %c0_71 = arith.constant 0 : index
    %272 = vector.load %arg2[%c2, %c0_71] : memref<8x128xf32, #tpu.memory_space<vmem>>, vector<2x32xf32>
    tpu.vector_store %arg2[%c2, %c0_71], %231 {strides = array<i32>} : memref<8x128xf32, #tpu.memory_space<vmem>>, vector<2x32xf32>,
    %c2_72 = arith.constant 2 : index
    %c32 = arith.constant 32 : index
    %273 = vector.load %arg2[%c2_72, %c32] : memref<8x128xf32, #tpu.memory_space<vmem>>, vector<2x32xf32>
    tpu.vector_store %arg2[%c2_72, %c32], %229 {strides = array<i32>} : memref<8x128xf32, #tpu.memory_space<vmem>>, vector<2x32xf32>,
    %c4 = arith.constant 4 : index
    %c0_73 = arith.constant 0 : index
    %274 = vector.load %arg2[%c4, %c0_73] : memref<8x128xf32, #tpu.memory_space<vmem>>, vector<2x32xf32>
    tpu.vector_store %arg2[%c4, %c0_73], %257 {strides = array<i32>} : memref<8x128xf32, #tpu.memory_space<vmem>>, vector<2x32xf32>,
    %c4_74 = arith.constant 4 : index
    %c32_75 = arith.constant 32 : index
    %275 = vector.load %arg2[%c4_74, %c32_75] : memref<8x128xf32, #tpu.memory_space<vmem>>, vector<2x32xf32>
    tpu.vector_store %arg2[%c4_74, %c32_75], %255 {strides = array<i32>} : memref<8x128xf32, #tpu.memory_space<vmem>>, vector<2x32xf32>,
    return
  }
}

</mosaic_0001>

<bundles_post_ra>
// kernel: encoder_decoder_rnn_forward.1
= control target key start
LH: loop header
LB: loop body
LE: loop exit
PB: predicated region body
PF: predicated region fallthrough
CT: control target
= control target key end

     0   :  { %7 = vsyncpa [#allocation3], 0  ;;  %s910_s12 = smov [#allocation2]   ;;  %s911_s14 = smov 128   ;;  %s1152_s0 = inlined_call_operand.vmem [shape: f32[2,128], index: 0, kind: input, shape index: {}]   ;;  %s1153_s1 = inlined_call_operand.hbm [shape: f32[312,128], index: 1, kind: input, shape index: {}]   ;;  %s1154_s2 = inlined_call_operand.vmem [shape: f32[8,128], index: 2, kind: output, shape index: {}]  }
   0x1   :  { %s14_s11 = sshll.u32 %s1153_s1, 4  ;;  %s16_s13 = sshll.u32 %s910_s12, 4  ;;  %s15_s11 = int_to_ptr.hbm [resolvable:$true] %s14_s11  ;;  %s17_s13 = int_to_ptr.vmem [resolvable:$true] %s16_s13 }
   0x2   :  { %s912_s15 = smov 8  }
   0x3   :  { %22 = dma.hbm_to_vmem [thread:$0]  %s15_s11, 4992, %s17_s13, [#allocation3], %s911_s14, %s911_s14, %s912_s15  }
   0x4   :  { %908 = dma.done.wait [#allocation3], 4992  }
   0x5   :  { %909 = vsyncadd [#allocation3], 4294962304  ;;  %v48_v0 = vld [vmem:[#allocation2 + $0x78] sm:$0xff]  ;;  %v47_v1 = vld [vmem:[#allocation2 + $0x70] sm:$0xff]  ;;  %v27_v17 = vlaneseq  ;;  %s914_s17 = smov 32   ;;  %s915_s18 = smov 48  }
   0x6   :  { %79 = vmatpush.msra.mxu0 %v48_v0  ;;  %v46_v2 = vld [vmem:[#allocation2 + $0x68] sm:$0xff]  ;;  %v45_v3 = vld [vmem:[#allocation2 + $0x60] sm:$0xff]  ;;  %v44_v4 = vld [vmem:[#allocation2 + $0x58] sm:$0xff]  ;;  %s916_s19 = smov 40   ;;  %s917_s20 = smov 56   ;;  %vm212_vm7 = vcmask 64512  }
   0x7   :  { %v43_v5 = vld [vmem:[#allocation2 + $0x50] sm:$0xff]  ;;  %v42_v6 = vld [vmem:[#allocation2 + $0x48] sm:$0xff]  ;;  %v41_v7 = vld [vmem:[#allocation2 + $0x40] sm:$0xff]  ;;  %v28_v18 = vand.u32 127, %v27_v17  ;;  %vm242_vm8 = vcmask 326656   ;;  %vm144_vm9 = vcmask 261120  }
   0x8   :  { %80 = vmatpush.msra.mxu0 %v47_v1  ;;  %v40_v8 = vld [vmem:[#allocation2 + $0x38] sm:$0xff]  ;;  %v39_v9 = vld [vmem:[#allocation2 + $0x30] sm:$0xff]  ;;  %v38_v10 = vld [vmem:[#allocation2 + $0x28] sm:$0xff]  ;;  %s919_s7 = smov 16  }
   0x9   :  { %v37_v11 = vld [vmem:[#allocation2 + $0x20] sm:$0xff]  ;;  %v36_v12 = vld [vmem:[#allocation2 + $0x18] sm:$0xff]  ;;  %v35_v13 = vld [vmem:[#allocation2 + $0x10] sm:$0xff]  ;;  %vm29_vm0 = vcmp.ge.s32.totalorder %v28_v18, 64  ;;  %vm30_vm1 = vcmp.lt.s32.totalorder %v28_v18, 96 }
   0xa   :  { %81 = vmatpush.msra.mxu0 %v46_v2  ;;  %v34_v14 = vld [vmem:[#allocation2 + $0x8] sm:$0xff]  ;;  %v33_v15 = vld [vmem:[#allocation2] sm:$0xff]  ;;  %v824_v19 = vld [vmem:[#allocation2 + $0x130] ss:$0 sm:$0xff] }
   0xb   :  { %v32_v16 = vld [vmem:[%s1152_s0] sm:$0x3]  ;;  %vm942_vm2 = vmand %vm29_vm0, %vm30_vm1  ;;  %s913_s0 = smov 64   ;;  %v56_v48 = vld [vmem:[#allocation2 + $0xb8] sm:$0xff] }
   0xc   :  { %82 = vmatpush.msra.mxu0 %v45_v3  ;;  %v57_v47 = vld [vmem:[#allocation2 + $0xc0] sm:$0xff]  ;;  %v55_v49 = vld [vmem:[#allocation2 + $0xb0] sm:$0xff]  ;;  %v54_v50 = vld [vmem:[#allocation2 + $0xa8] sm:$0xff] }
   0xd   :  { %257 = vmatpush.msra.mxu3 %v57_v47  ;;  %v58_v53 = vld [vmem:[#allocation2 + $0xc8] sm:$0xff]  ;;  %v53_v54 = vld [vmem:[#allocation2 + $0xa0] sm:$0xff]  ;;  %v52_v55 = vld [vmem:[#allocation2 + $0x98] sm:$0xff] }
   0xe   :  { %83 = vmatpush.msra.mxu0 %v44_v4  ;;  %v51_v56 = vld [vmem:[#allocation2 + $0x90] sm:$0xff]  ;;  %159 = vmatpush.msra.mxu1 %v52_v55  ;;  %v50_v57 = vld [vmem:[#allocation2 + $0x88] sm:$0xff]  ;;  %v49_v58 = vld [vmem:[#allocation2 + $0x80] sm:$0xff] }
   0xf   :  { %258 = vmatpush.msra.mxu3 %v56_v48  ;;  %v825_v0 = vld [vmem:[#allocation2 + $0x132] ss:$0 sm:$0xff] }
  0x10   :  { %84 = vmatpush.msra.mxu0 %v43_v5  ;;  %160 = vmatpush.msra.mxu1 %v51_v56 }
  0x11   :  { %259 = vmatpush.msra.mxu3 %v55_v49 }
  0x12   :  { %85 = vmatpush.msra.mxu0 %v42_v6  ;;  %161 = vmatpush.msra.mxu1 %v50_v57 }
  0x13   :  { %260 = vmatpush.msra.mxu3 %v54_v50 }
  0x14   :  { %86 = vmatpush.msra.mxu0 %v41_v7  ;;  %162 = vmatpush.msra.mxu1 %v49_v58  ;;  %v983_v58 = vld [vmem:[#allocation2 + $0x108] sm:$0xff] }
  0x15   :  { %261 = vmatpush.msra.mxu3 %v53_v54  ;;  %329 = vmatpush.msra.mxu2 %v983_v58 }
  0x16   :  { %87 = vmatpush.msra.mxu0 %v40_v8  ;;  %v826_v8 = vld [vmem:[#allocation2 + $0x131] ss:$0 sm:$0xff] }
  0x17   :  { %437 = vmatpush.msrb.mxu3 %v57_v47 }
  0x18   :  { %88 = vmatpush.msra.mxu0 %v39_v9 }
  0x19   :  { %438 = vmatpush.msrb.mxu3 %v56_v48 }
  0x1a   :  { %89 = vmatpush.msra.mxu0 %v38_v10 }
  0x1b   :  { %439 = vmatpush.msrb.mxu3 %v55_v49 }
  0x1c   :  { %90 = vmatpush.msra.mxu0 %v37_v11 }
  0x1d   :  { %440 = vmatpush.msrb.mxu3 %v54_v50 }
  0x1e   :  { %91 = vmatpush.msra.mxu0 %v36_v12 }
  0x1f   :  { %441 = vmatpush.msrb.mxu3 %v53_v54 }
  0x20   :  { %92 = vmatpush.msra.mxu0 %v35_v13 }
  0x22   :  { %93 = vmatpush.msra.mxu0 %v34_v14 }
  0x24   :  { %94 = vmatpush.msra.mxu0 %v33_v15 }
  0x25   :  { %95 = vmatmul.f32.vlgmr.msra.gmra.mxu0 %v32_v16 }
  0x26   :  { %230 = vmatpush.msrb.mxu0 %v58_v53 }
  0xa2   :  { %v96_v20 = vpop.f32.mrf.mxu0 }
  0xa3   :  { %v97_v21 = vadd.f32 %v824_v19, %v96_v20 }
  0xa5   :  { %v99_v23 = vmul.f32 2.0, %v97_v21 }
  0xa7   :  { %v100_v24 = vsel %vm942_vm2, %v99_v23, %v97_v21 }
  0xa8   :  { %v787_v25 = vmul.f32 -1.442695, %v100_v24 }
  0xaa   :  { %830 = vpow2.f32 %v787_v25 }
  0xb0   :  { %v831_v26 = vpop.eup %830 }
  0xb1   :  { %v104_v27 = vadd.f32 1.0, %v831_v26 }
  0xb3   :  { %832 = vrcp.f32 %v104_v27  ;;  %v116_v31 = vand.u32 2147483648, %v104_v27  ;;  %v114_v33 = vand.u32 2147483647, %v104_v27  ;;  %vm110_vm4 = vweird.f32 %v104_v27 }
  0xb5   :  { %v117_v35 = vor.u32 1.1754944e-38, %v116_v31  ;;  %vm115_vm6 = vcmp.eq.f32.partialorder %v114_v33, 8.507059e+37 }
  0xb9   :  { %v833_v28 = vpop.eup %832 }
  0xba   :  { %v106_v29 = vmul.f32 %v833_v28, %v104_v27  ;;  %vm111_vm3 = vweird.f32 %v833_v28 }
  0xbb   :  { %vm112_vm5 = vmor %vm110_vm4, %vm111_vm3  ;;  %vm317_vm3 = vcmask 523264  }
  0xbc   :  { %v107_v30 = vsub.f32 1.0, %v106_v29 }
  0xbe   :  { %v108_v32 = vmul.f32 %v833_v28, %v107_v30 }
  0xc0   :  { %v109_v34 = vadd.f32 %v833_v28, %v108_v32 }
  0xc2   :  { %v113_v36 = vsel %vm112_vm5, %v833_v28, %v109_v34 }
  0xc3   :  { %v118_v37 = vsel %vm115_vm6, %v117_v35, %v113_v36 }
  0xc4   :  { %v120_v38 = vmul.f32 2.0, %v118_v37 }
  0xc6   :  { %v788_v39 = vadd.f32 -1.0, %v120_v38 }
  0xc8   :  { %v122_v40 = vsel %vm942_vm2, %v788_v39, %v118_v37 }
  0xc9   :  { %125 = vrot.lane.b32.xlu0 %v122_v40, %s913_s0  ;;  %v123_v43 = vmul.f32 0.0, %v122_v40 }
 0x13b   :  { %v126_v41 = vpop.permute.xlu0 %125 }
 0x13c   :  { %v128_v42 = vmul.f32 %v126_v41, %v122_v40 }
 0x13e   :  { %130 = vrot.lane.b32.xlu0 %v128_v42, %s914_s17 }
 0x1b0   :  { %v131_v44 = vpop.permute.xlu0 %130 }
 0x1b1   :  { %v952_v45 = vadd.f32 %v131_v44, %v123_v43 }
 0x1b3   :  { %834 = vtanh.f32 %v952_v45 }
 0x1b9   :  { %v835_v46 = vpop.eup %834 }
 0x1ba   :  { %136 = vrot.lane.b32.xlu1 %v835_v46, %s913_s0 }
 0x1c2   :  { %235 = vrot.lane.b32.xlu1 %v32_v16, %s915_s18 }
 0x22c   :  { %v137_v51 = vpop.permute.xlu1 %136 }
 0x22d   :  { %v139_v52 = vmul.f32 %v137_v51, %v122_v40 }
 0x22f   :  { %142 = vrot.lane.b32.xlu0 %v139_v52, %s914_s17  ;;  %238 = vrot.lane.b32.xlu2 %v139_v52, %s916_s19 }
 0x234   :  { %v236_v59 = vpop.permute.xlu1 %235 }
 0x237   :  { %210 = vrot.lane.b32.xlu2 %v32_v16, %s917_s20 }
 0x289   :  { %v239_v60 = vpop.permute.xlu2 %238 }
 0x28a   :  { %v241_v61 = vsel %vm212_vm7, %v236_v59, %v239_v60  ;;  %v985_v59 = vld [vmem:[#allocation2 + $0x100] sm:$0xff] }
 0x28b   :  { %793 = vmatmul.msk.f32.vlgmr.msra.gmra.mxu3 %vm242_vm8, %v241_v61  ;;  %330 = vmatpush.msra.mxu2 %v985_v59 }
 0x28c   :  { %615 = vmatpush.msra.mxu3 %v57_v47 }
 0x28e   :  { %616 = vmatpush.msra.mxu3 %v56_v48 }
 0x290   :  { %617 = vmatpush.msra.mxu3 %v55_v49 }
 0x291   :  { %v211_v62 = vpop.permute.xlu2 %210 }
 0x292   :  { %792 = vmatmul.msk.f32.vlgmr.msrb.gmra.mxu0 %vm212_vm7, %v211_v62  ;;  %618 = vmatpush.msra.mxu3 %v54_v50 }
 0x294   :  { %619 = vmatpush.msra.mxu3 %v53_v54 }
 0x2a1   :  { %v143_v63 = vpop.permute.xlu0 %142 }
 0x2a2   :  { %789 = vmatmul.msk.f32.vlgmr.msra.gmra.mxu1 %vm144_vm9, %v143_v63  ;;  %v991_v63 = vld [vmem:[#allocation2 + $0xf8] sm:$0xff] }
 0x2a3   :  { %331 = vmatpush.msra.mxu2 %v991_v63 }
 0x30e   :  { %v263_v3 = vpop.f32.mrf.mxu3 }
 0x30f   :  { %v232_v1 = vpop.f32.mrf.mxu0 }
 0x310   :  { %v962_v2 = vadd.f32 %v825_v0, %v232_v1  ;;  %v993_v0 = vld [vmem:[#allocation2 + $0xf0] sm:$0xff]  ;;  %v996_v1 = vld [vmem:[#allocation2 + $0xe8] sm:$0xff] }
 0x311   :  { %332 = vmatpush.msra.mxu2 %v993_v0 }
 0x312   :  { %v264_v4 = vadd.f32 %v263_v3, %v962_v2  ;;  %v999_v3 = vld [vmem:[#allocation2 + $0xe0] sm:$0xff] }
 0x313   :  { %333 = vmatpush.msra.mxu2 %v996_v1 }
 0x314   :  { %v266_v5 = vmul.f32 2.0, %v264_v4 }
 0x315   :  { %334 = vmatpush.msra.mxu2 %v999_v3 }
 0x316   :  { %v267_v6 = vsel %vm942_vm2, %v266_v5, %v264_v4  ;;  %v1002_v4 = vld [vmem:[#allocation2 + $0xd8] sm:$0xff]  ;;  %v1006_v5 = vld [vmem:[#allocation2 + $0xd0] sm:$0xff] }
 0x317   :  { %v794_v7 = vmul.f32 -1.442695, %v267_v6  ;;  %335 = vmatpush.msra.mxu2 %v1002_v4 }
 0x319   :  { %836 = vpow2.f32 %v794_v7  ;;  %336 = vmatpush.msra.mxu2 %v1006_v5 }
 0x31f   :  { %v837_v9 = vpop.eup %836  ;;  %v164_v10 = vpop.f32.mrf.mxu1 }
 0x320   :  { %v271_v11 = vadd.f32 1.0, %v837_v9  ;;  %v165_v12 = vadd.f32 %v826_v8, %v164_v10  ;;  %v1011_v9 = vld [vmem:[#allocation2 + $0x133] ss:$0 sm:$0xff] }
 0x322   :  { %838 = vrcp.f32 %v271_v11  ;;  %v167_v13 = vmul.f32 2.0, %v165_v12  ;;  %v283_v19 = vand.u32 2147483648, %v271_v11  ;;  %v281_v23 = vand.u32 2147483647, %v271_v11 }
 0x323   :  { %vm277_vm11 = vweird.f32 %v271_v11 }
 0x324   :  { %v168_v14 = vsel %vm942_vm2, %v167_v13, %v165_v12  ;;  %v284_v26 = vor.u32 1.1754944e-38, %v283_v19  ;;  %vm282_vm13 = vcmp.eq.f32.partialorder %v281_v23, 8.507059e+37 }
 0x325   :  { %v790_v15 = vmul.f32 -1.442695, %v168_v14 }
 0x327   :  { %840 = vpow2.f32 %v790_v15 }
 0x328   :  { %v839_v16 = vpop.eup %838 }
 0x329   :  { %v273_v17 = vmul.f32 %v839_v16, %v271_v11  ;;  %vm278_vm10 = vweird.f32 %v839_v16 }
 0x32a   :  { %vm279_vm12 = vmor %vm277_vm11, %vm278_vm10  ;;  %vm411_vm11 = vcmask 1041408  }
 0x32b   :  { %v274_v18 = vsub.f32 1.0, %v273_v17 }
 0x32d   :  { %v841_v20 = vpop.eup %840  ;;  %v275_v21 = vmul.f32 %v839_v16, %v274_v18 }
 0x32e   :  { %v172_v24 = vadd.f32 1.0, %v841_v20 }
 0x32f   :  { %v276_v25 = vadd.f32 %v839_v16, %v275_v21 }
 0x330   :  { %842 = vrcp.f32 %v172_v24  ;;  %v184_v35 = vand.u32 2147483648, %v172_v24  ;;  %v182_v37 = vand.u32 2147483647, %v172_v24  ;;  %vm178_vm15 = vweird.f32 %v172_v24 }
 0x331   :  { %v280_v27 = vsel %vm279_vm12, %v839_v16, %v276_v25  ;;  %vm417_vm12 = vcmask 58368  }
 0x332   :  { %v285_v28 = vsel %vm282_vm13, %v284_v26, %v280_v27  ;;  %v185_v39 = vor.u32 1.1754944e-38, %v184_v35  ;;  %vm183_vm1 = vcmp.eq.f32.partialorder %v182_v37, 8.507059e+37  ;;  %v70_v37 = vld [vmem:[#allocation2 + $0x128] sm:$0xff] }
 0x333   :  { %v287_v29 = vmul.f32 2.0, %v285_v28  ;;  %400 = vmatpush.msrb.mxu1 %v70_v37  ;;  %576 = vmatpush.msrb.mxu2 %v70_v37 }
 0x335   :  { %v795_v30 = vadd.f32 -1.0, %v287_v29 }
 0x336   :  { %v843_v31 = vpop.eup %842 }
 0x337   :  { %v289_v32 = vsel %vm942_vm2, %v795_v30, %v285_v28  ;;  %v174_v33 = vmul.f32 %v843_v31, %v172_v24  ;;  %vm179_vm14 = vweird.f32 %v843_v31 }
 0x338   :  { %292 = vrot.lane.b32.xlu2 %v289_v32, %s913_s0  ;;  %vm180_vm0 = vmor %vm178_vm15, %vm179_vm14  ;;  %v290_v50 = vmul.f32 %v289_v32, %v952_v45 }
 0x339   :  { %v175_v34 = vsub.f32 1.0, %v174_v33 }
 0x33b   :  { %v176_v36 = vmul.f32 %v843_v31, %v175_v34 }
 0x33d   :  { %v177_v38 = vadd.f32 %v843_v31, %v176_v36 }
 0x33f   :  { %v181_v40 = vsel %vm180_vm0, %v843_v31, %v177_v38  ;;  %v69_v38 = vld [vmem:[#allocation2 + $0x120] sm:$0xff] }
 0x340   :  { %v186_v41 = vsel %vm183_vm1, %v185_v39, %v181_v40  ;;  %v68_v39 = vld [vmem:[#allocation2 + $0x118] sm:$0xff]  ;;  %401 = vmatpush.msrb.mxu1 %v69_v38  ;;  %577 = vmatpush.msrb.mxu2 %v69_v38  ;;  %v67_v40 = vld [vmem:[#allocation2 + $0x110] sm:$0xff] }
 0x341   :  { %v188_v42 = vmul.f32 2.0, %v186_v41 }
 0x342   :  { %402 = vmatpush.msrb.mxu1 %v68_v39  ;;  %578 = vmatpush.msrb.mxu2 %v68_v39 }
 0x343   :  { %v791_v43 = vadd.f32 -1.0, %v188_v42 }
 0x344   :  { %403 = vmatpush.msrb.mxu1 %v67_v40  ;;  %579 = vmatpush.msrb.mxu2 %v67_v40 }
 0x345   :  { %v190_v44 = vsel %vm942_vm2, %v791_v43, %v186_v41 }
 0x346   :  { %193 = vrot.lane.b32.xlu1 %v190_v44, %s913_s0  ;;  %v191_v54 = vmul.f32 0.0, %v190_v44  ;;  %506 = vmatpush.msra.mxu1 %v983_v58 }
 0x348   :  { %507 = vmatpush.msra.mxu1 %v985_v59 }
 0x34a   :  { %508 = vmatpush.msra.mxu1 %v991_v63 }
 0x34c   :  { %509 = vmatpush.msra.mxu1 %v993_v0 }
 0x34e   :  { %510 = vmatpush.msra.mxu1 %v996_v1 }
 0x350   :  { %511 = vmatpush.msra.mxu1 %v999_v3 }
 0x352   :  { %512 = vmatpush.msra.mxu1 %v1002_v4 }
 0x354   :  { %513 = vmatpush.msra.mxu1 %v1006_v5 }
 0x392   :  { %v293_v46 = vpop.permute.xlu2 %292 }
 0x393   :  { %v295_v47 = vmul.f32 %v293_v46, %v289_v32 }
 0x395   :  { %297 = vrot.lane.b32.xlu1 %v295_v47, %s914_s17 }
 0x3b8   :  { %v194_v48 = vpop.permute.xlu1 %193 }
 0x3b9   :  { %v196_v49 = vmul.f32 %v194_v48, %v190_v44  ;;  %v1049_v48 = vld [vmem:[#allocation2 + $0x135] ss:$0 sm:$0xff] }
 0x3bb   :  { %198 = vrot.lane.b32.xlu0 %v196_v49, %s914_s17 }
 0x407   :  { %v298_v51 = vpop.permute.xlu1 %297 }
 0x408   :  { %v978_v52 = vadd.f32 %v298_v51, %v290_v50 }
 0x40a   :  { %844 = vtanh.f32 %v978_v52 }
 0x410   :  { %v845_v53 = vpop.eup %844 }
 0x411   :  { %303 = vrot.lane.b32.xlu0 %v845_v53, %s913_s0  ;;  %v918_v53 = vmov 0.0  }
 0x412   :  { %77 = vst [vmem:[%s1154_s2] sm:$0xff] %v918_v53 }
 0x42d   :  { %v199_v55 = vpop.permute.xlu0 %198 }
 0x42e   :  { %v201_v56 = vadd.f32 %v199_v55, %v191_v54 }
 0x430   :  { %846 = vtanh.f32 %v201_v56 }
 0x436   :  { %v847_v57 = vpop.eup %846 }
 0x437   :  { %204 = vrot.lane.b32.xlu2 %v847_v57, %s913_s0 }
 0x483   :  { %v304_v45 = vpop.permute.xlu0 %303 }
 0x484   :  { %v306_v60 = vmul.f32 %v304_v45, %v289_v32 }
 0x486   :  { %308 = vrot.lane.b32.xlu1 %v306_v60, %s914_s17 }
 0x491   :  { %v205_v61 = vpop.permute.xlu2 %204 }
 0x492   :  { %v207_v62 = vmul.f32 %v205_v61, %v190_v44  ;;  %v1046_v44 = vld [vmem:[#allocation2 + $0x134] ss:$0 sm:$0xff] }
 0x494   :  { %312 = vrot.lane.b32.xlu2 %v207_v62, %s913_s0 }
 0x4ee   :  { %v313_v6 = vpop.permute.xlu2 %312 }
 0x4f8   :  { %v309_v7 = vpop.permute.xlu1 %308 }
 0x4f9   :  { %v315_v8 = vsel %vm144_vm9, %v309_v7, %v313_v6 }
 0x4fa   :  { %796 = vmatmul.msk.f32.vlgmr.msra.gmra.mxu2 %vm317_vm3, %v315_v8 }
 0x4fb   :  { %684 = vmatpush.msra.mxu2 %v983_v58 }
 0x4fd   :  { %685 = vmatpush.msra.mxu2 %v985_v59 }
 0x4ff   :  { %686 = vmatpush.msra.mxu2 %v991_v63 }
 0x501   :  { %687 = vmatpush.msra.mxu2 %v993_v0 }
 0x503   :  { %688 = vmatpush.msra.mxu2 %v996_v1 }
 0x505   :  { %689 = vmatpush.msra.mxu2 %v999_v3 }
 0x507   :  { %690 = vmatpush.msra.mxu2 %v1002_v4 }
 0x509   :  { %691 = vmatpush.msra.mxu2 %v1006_v5 }
 0x57d   :  { %v338_v10 = vpop.f32.mrf.mxu2 }
 0x57e   :  { %v339_v11 = vadd.f32 %v1011_v9, %v338_v10 }
 0x580   :  { %v341_v12 = vmul.f32 2.0, %v339_v11 }
 0x582   :  { %v342_v13 = vsel %vm942_vm2, %v341_v12, %v339_v11 }
 0x583   :  { %v797_v14 = vmul.f32 -1.442695, %v342_v13 }
 0x585   :  { %848 = vpow2.f32 %v797_v14 }
 0x58b   :  { %v849_v15 = vpop.eup %848 }
 0x58c   :  { %v346_v16 = vadd.f32 1.0, %v849_v15 }
 0x58e   :  { %850 = vrcp.f32 %v346_v16  ;;  %v358_v20 = vand.u32 2147483648, %v346_v16  ;;  %v356_v23 = vand.u32 2147483647, %v346_v16  ;;  %vm352_vm5 = vweird.f32 %v346_v16 }
 0x590   :  { %v359_v25 = vor.u32 1.1754944e-38, %v358_v20  ;;  %vm357_vm10 = vcmp.eq.f32.partialorder %v356_v23, 8.507059e+37 }
 0x594   :  { %v851_v17 = vpop.eup %850 }
 0x595   :  { %v348_v18 = vmul.f32 %v851_v17, %v346_v16  ;;  %vm353_vm4 = vweird.f32 %v851_v17 }
 0x596   :  { %vm354_vm6 = vmor %vm352_vm5, %vm353_vm4 }
 0x597   :  { %v349_v19 = vsub.f32 1.0, %v348_v18 }
 0x599   :  { %v350_v21 = vmul.f32 %v851_v17, %v349_v19 }
 0x59b   :  { %v351_v24 = vadd.f32 %v851_v17, %v350_v21 }
 0x59d   :  { %v355_v26 = vsel %vm354_vm6, %v851_v17, %v351_v24 }
 0x59e   :  { %v360_v27 = vsel %vm357_vm10, %v359_v25, %v355_v26 }
 0x59f   :  { %v362_v28 = vmul.f32 2.0, %v360_v27 }
 0x5a1   :  { %v798_v29 = vadd.f32 -1.0, %v362_v28 }
 0x5a3   :  { %v364_v30 = vsel %vm942_vm2, %v798_v29, %v360_v27 }
 0x5a4   :  { %367 = vrot.lane.b32.xlu0 %v364_v30, %s913_s0  ;;  %v365_v33 = vmul.f32 %v364_v30, %v201_v56 }
 0x616   :  { %v368_v31 = vpop.permute.xlu0 %367 }
 0x617   :  { %v370_v32 = vmul.f32 %v368_v31, %v364_v30 }
 0x619   :  { %372 = vrot.lane.b32.xlu1 %v370_v32, %s914_s17 }
 0x68b   :  { %v373_v34 = vpop.permute.xlu1 %372 }
 0x68c   :  { %v1020_v35 = vadd.f32 %v373_v34, %v365_v33 }
 0x68e   :  { %852 = vtanh.f32 %v1020_v35 }
 0x694   :  { %v853_v36 = vpop.eup %852 }
 0x695   :  { %378 = vrot.lane.b32.xlu2 %v853_v36, %s913_s0 }
 0x69d   :  { %419 = vrot.lane.b32.xlu2 %v306_v60, %s916_s19 }
 0x6ef   :  { %v379_v41 = vpop.permute.xlu2 %378 }
 0x6f0   :  { %v1041_v42 = vmul.f32 %v379_v41, %v364_v30 }
 0x6f2   :  { %384 = vrot.lane.b32.xlu0 %v1041_v42, %s914_s17 }
 0x6f7   :  { %v420_v57 = vpop.permute.xlu2 %419 }
 0x764   :  { %v385_v43 = vpop.permute.xlu0 %384 }
 0x765   :  { %799 = vmatmul.msk.f32.vlgmr.msrb.gmra.mxu1 %vm144_vm9, %v385_v43 }
 0x7e2   :  { %v405_v46 = vpop.f32.mrf.mxu1 }
 0x7e3   :  { %v406_v47 = vadd.f32 %v1046_v44, %v405_v46 }
 0x7e5   :  { %v408_v49 = vmax.f32 %v406_v47, 0.0 }
 0x7e7   :  { %v410_v50 = vmul.f32 %v1049_v48, %v408_v49 }
 0x7e9   :  { %v412_v51 = vsel %vm411_vm11, %v410_v50, 0.0 }
 0x7ea   :  { %413 = vadd.xlane.f32.xlu1 %v412_v51 }
 0x85d   :  { %v414_v54 = vpop.xlane.xlu1 %413 }
 0x85e   :  { %854 = vrcp.f32 %v414_v54 }
 0x864   :  { %v855_v55 = vpop.eup %854 }
 0x865   :  { %v416_v56 = vmul.f32 %v855_v55, %v408_v49 }
 0x867   :  { %v422_v58 = vsel %vm212_vm7, %v416_v56, %v420_v57  ;;  %418 = vst.msk [vmem:[%s1154_s2] sm:$0x3] %vm417_vm12, %v416_v56 }
 0x868   :  { %800 = vmatmul.msk.f32.vlgmr.msrb.gmra.mxu3 %vm242_vm8, %v422_v58 }
 0x869   :  { %754 = vmatpush.msrb.mxu3 %v70_v37 }
 0x86b   :  { %755 = vmatpush.msrb.mxu3 %v69_v38 }
 0x86d   :  { %756 = vmatpush.msrb.mxu3 %v68_v39 }
 0x86f   :  { %757 = vmatpush.msrb.mxu3 %v67_v40 }
 0x8eb   :  { %v443_v59 = vpop.f32.mrf.mxu3 }
 0x8ec   :  { %v444_v45 = vadd.f32 %v443_v59, %v962_v2 }
 0x8ee   :  { %v446_v60 = vmul.f32 2.0, %v444_v45 }
 0x8f0   :  { %v447_v61 = vsel %vm942_vm2, %v446_v60, %v444_v45 }
 0x8f1   :  { %v801_v62 = vmul.f32 -1.442695, %v447_v61 }
 0x8f3   :  { %856 = vpow2.f32 %v801_v62 }
 0x8f9   :  { %v857_v63 = vpop.eup %856 }
 0x8fa   :  { %v451_v0 = vadd.f32 1.0, %v857_v63 }
 0x8fc   :  { %858 = vrcp.f32 %v451_v0  ;;  %v463_v5 = vand.u32 2147483648, %v451_v0  ;;  %v461_v7 = vand.u32 2147483647, %v451_v0  ;;  %vm457_vm14 = vweird.f32 %v451_v0 }
 0x8fe   :  { %v464_v10 = vor.u32 1.1754944e-38, %v463_v5  ;;  %vm462_vm0 = vcmp.eq.f32.partialorder %v461_v7, 8.507059e+37 }
 0x902   :  { %v859_v1 = vpop.eup %858 }
 0x903   :  { %v453_v3 = vmul.f32 %v859_v1, %v451_v0  ;;  %vm458_vm13 = vweird.f32 %v859_v1 }
 0x904   :  { %vm459_vm15 = vmor %vm457_vm14, %vm458_vm13  ;;  %vm775_vm13 = vcmask 254976   ;;  %vm777_vm14 = vcmask 517376  }
 0x905   :  { %v454_v4 = vsub.f32 1.0, %v453_v3 }
 0x907   :  { %v455_v6 = vmul.f32 %v859_v1, %v454_v4 }
 0x909   :  { %v456_v8 = vadd.f32 %v859_v1, %v455_v6 }
 0x90b   :  { %v460_v11 = vsel %vm459_vm15, %v859_v1, %v456_v8 }
 0x90c   :  { %v465_v12 = vsel %vm462_vm0, %v464_v10, %v460_v11 }
 0x90d   :  { %v467_v13 = vmul.f32 2.0, %v465_v12 }
 0x90f   :  { %v802_v14 = vadd.f32 -1.0, %v467_v13 }
 0x911   :  { %v469_v15 = vsel %vm942_vm2, %v802_v14, %v465_v12 }
 0x912   :  { %472 = vrot.lane.b32.xlu0 %v469_v15, %s913_s0  ;;  %v470_v18 = vmul.f32 %v469_v15, %v978_v52 }
 0x984   :  { %v473_v16 = vpop.permute.xlu0 %472 }
 0x985   :  { %v475_v17 = vmul.f32 %v473_v16, %v469_v15 }
 0x987   :  { %477 = vrot.lane.b32.xlu2 %v475_v17, %s914_s17 }
 0x9e1   :  { %v478_v19 = vpop.permute.xlu2 %477 }
 0x9e2   :  { %v1069_v20 = vadd.f32 %v478_v19, %v470_v18 }
 0x9e4   :  { %860 = vtanh.f32 %v1069_v20 }
 0x9ea   :  { %v861_v21 = vpop.eup %860 }
 0x9eb   :  { %483 = vrot.lane.b32.xlu0 %v861_v21, %s913_s0 }
 0x9f3   :  { %491 = vrot.lane.b32.xlu0 %v1041_v42, %s913_s0 }
 0xa5d   :  { %v484_v23 = vpop.permute.xlu0 %483 }
 0xa5e   :  { %v486_v24 = vmul.f32 %v484_v23, %v469_v15 }
 0xa60   :  { %597 = vrot.lane.b32.xlu1 %v486_v24, %s916_s19  ;;  %488 = vrot.lane.b32.xlu2 %v486_v24, %s914_s17 }
 0xa65   :  { %v492_v25 = vpop.permute.xlu0 %491 }
 0xaba   :  { %v489_v26 = vpop.permute.xlu2 %488 }
 0xabb   :  { %v494_v52 = vsel %vm144_vm9, %v489_v26, %v492_v25 }
 0xabc   :  { %803 = vmatmul.msk.f32.vlgmr.msra.gmra.mxu1 %vm317_vm3, %v494_v52 }
 0xad2   :  { %v598_v4 = vpop.permute.xlu1 %597 }
 0xb39   :  { %v515_v27 = vpop.f32.mrf.mxu1 }
 0xb3a   :  { %v516_v28 = vadd.f32 %v1011_v9, %v515_v27 }
 0xb3c   :  { %v518_v29 = vmul.f32 2.0, %v516_v28 }
 0xb3e   :  { %v519_v30 = vsel %vm942_vm2, %v518_v29, %v516_v28 }
 0xb3f   :  { %v804_v31 = vmul.f32 -1.442695, %v519_v30 }
 0xb41   :  { %862 = vpow2.f32 %v804_v31 }
 0xb47   :  { %v863_v32 = vpop.eup %862 }
 0xb48   :  { %v523_v33 = vadd.f32 1.0, %v863_v32 }
 0xb4a   :  { %864 = vrcp.f32 %v523_v33  ;;  %v535_v38 = vand.u32 2147483648, %v523_v33  ;;  %v533_v40 = vand.u32 2147483647, %v523_v33  ;;  %vm529_vm4 = vweird.f32 %v523_v33 }
 0xb4c   :  { %v536_v42 = vor.u32 1.1754944e-38, %v535_v38  ;;  %vm534_vm6 = vcmp.eq.f32.partialorder %v533_v40, 8.507059e+37 }
 0xb50   :  { %v865_v34 = vpop.eup %864 }
 0xb51   :  { %v525_v36 = vmul.f32 %v865_v34, %v523_v33  ;;  %vm530_vm1 = vweird.f32 %v865_v34 }
 0xb52   :  { %vm531_vm5 = vmor %vm529_vm4, %vm530_vm1 }
 0xb53   :  { %v526_v37 = vsub.f32 1.0, %v525_v36 }
 0xb55   :  { %v527_v39 = vmul.f32 %v865_v34, %v526_v37 }
 0xb57   :  { %v528_v41 = vadd.f32 %v865_v34, %v527_v39 }
 0xb59   :  { %v532_v43 = vsel %vm531_vm5, %v865_v34, %v528_v41 }
 0xb5a   :  { %v537_v46 = vsel %vm534_vm6, %v536_v42, %v532_v43 }
 0xb5b   :  { %v539_v47 = vmul.f32 2.0, %v537_v46 }
 0xb5d   :  { %v805_v49 = vadd.f32 -1.0, %v539_v47 }
 0xb5f   :  { %v541_v50 = vsel %vm942_vm2, %v805_v49, %v537_v46 }
 0xb60   :  { %544 = vrot.lane.b32.xlu2 %v541_v50, %s913_s0  ;;  %v542_v54 = vmul.f32 %v541_v50, %v1020_v35 }
 0xbba   :  { %v545_v51 = vpop.permute.xlu2 %544 }
 0xbbb   :  { %v547_v53 = vmul.f32 %v545_v51, %v541_v50 }
 0xbbd   :  { %549 = vrot.lane.b32.xlu0 %v547_v53, %s914_s17 }
 0xc2f   :  { %v550_v55 = vpop.permute.xlu0 %549 }
 0xc30   :  { %v1087_v56 = vadd.f32 %v550_v55, %v542_v54 }
 0xc32   :  { %866 = vtanh.f32 %v1087_v56 }
 0xc38   :  { %v867_v57 = vpop.eup %866 }
 0xc39   :  { %555 = vrot.lane.b32.xlu2 %v867_v57, %s913_s0 }
 0xc93   :  { %v556_v58 = vpop.permute.xlu2 %555 }
 0xc94   :  { %v558_v59 = vmul.f32 %v556_v58, %v541_v50 }
 0xc96   :  { %560 = vrot.lane.b32.xlu0 %v558_v59, %s914_s17 }
 0xd08   :  { %v561_v45 = vpop.permute.xlu0 %560 }
 0xd09   :  { %806 = vmatmul.msk.f32.vlgmr.msrb.gmra.mxu2 %vm144_vm9, %v561_v45 }
 0xd8c   :  { %v581_v60 = vpop.f32.mrf.mxu2 }
 0xd8d   :  { %v582_v61 = vadd.f32 %v1046_v44, %v581_v60 }
 0xd8f   :  { %v584_v62 = vmax.f32 %v582_v61, 0.0 }
 0xd91   :  { %v585_v35 = vmul.f32 %v1049_v48, %v584_v62 }
 0xd93   :  { %v586_v63 = vsel %vm411_vm11, %v585_v35, 0.0 }
 0xd94   :  { %587 = vadd.xlane.f32.xlu2 %v586_v63 }
 0xe07   :  { %v588_v0 = vpop.xlane.xlu2 %587 }
 0xe08   :  { %868 = vrcp.f32 %v588_v0 }
 0xe0e   :  { %v869_v1 = vpop.eup %868 }
 0xe0f   :  { %v1096_v3 = vmul.f32 %v869_v1, %v584_v62 }
 0xe11   :  { %v600_v5 = vsel %vm212_vm7, %v1096_v3, %v598_v4 }
 0xe12   :  { %807 = vmatmul.msk.f32.vlgmr.msra.gmra.mxu3 %vm242_vm8, %v600_v5 }
 0xe95   :  { %v621_v6 = vpop.f32.mrf.mxu3 }
 0xe96   :  { %v622_v7 = vadd.f32 %v621_v6, %v962_v2 }
 0xe98   :  { %v624_v8 = vmul.f32 2.0, %v622_v7 }
 0xe9a   :  { %v625_v10 = vsel %vm942_vm2, %v624_v8, %v622_v7 }
 0xe9b   :  { %v808_v11 = vmul.f32 -1.442695, %v625_v10 }
 0xe9d   :  { %870 = vpow2.f32 %v808_v11 }
 0xea3   :  { %v871_v12 = vpop.eup %870 }
 0xea4   :  { %v629_v13 = vadd.f32 1.0, %v871_v12 }
 0xea6   :  { %872 = vrcp.f32 %v629_v13  ;;  %v641_v17 = vand.u32 2147483648, %v629_v13  ;;  %v639_v19 = vand.u32 2147483647, %v629_v13  ;;  %vm635_vm8 = vweird.f32 %v629_v13 }
 0xea8   :  { %v642_v2 = vor.u32 1.1754944e-38, %v641_v17  ;;  %vm640_vm12 = vcmp.eq.f32.partialorder %v639_v19, 8.507059e+37 }
 0xeac   :  { %v873_v14 = vpop.eup %872 }
 0xead   :  { %v631_v15 = vmul.f32 %v873_v14, %v629_v13  ;;  %vm636_vm7 = vweird.f32 %v873_v14 }
 0xeae   :  { %vm637_vm10 = vmor %vm635_vm8, %vm636_vm7 }
 0xeaf   :  { %v632_v16 = vsub.f32 1.0, %v631_v15 }
 0xeb1   :  { %v633_v18 = vmul.f32 %v873_v14, %v632_v16 }
 0xeb3   :  { %v634_v21 = vadd.f32 %v873_v14, %v633_v18 }
 0xeb5   :  { %v638_v23 = vsel %vm637_vm10, %v873_v14, %v634_v21 }
 0xeb6   :  { %v643_v24 = vsel %vm640_vm12, %v642_v2, %v638_v23 }
 0xeb7   :  { %v645_v25 = vmul.f32 2.0, %v643_v24 }
 0xeb9   :  { %v809_v26 = vadd.f32 -1.0, %v645_v25 }
 0xebb   :  { %v647_v52 = vsel %vm942_vm2, %v809_v26, %v643_v24 }
 0xebc   :  { %650 = vrot.lane.b32.xlu0 %v647_v52, %s913_s0  ;;  %v648_v29 = vmul.f32 %v647_v52, %v1069_v20 }
 0xf2e   :  { %v651_v27 = vpop.permute.xlu0 %650 }
 0xf2f   :  { %v653_v28 = vmul.f32 %v651_v27, %v647_v52 }
 0xf31   :  { %655 = vrot.lane.b32.xlu0 %v653_v28, %s914_s17 }
 0xfa3   :  { %v656_v30 = vpop.permute.xlu0 %655 }
 0xfa4   :  { %v658_v31 = vadd.f32 %v656_v30, %v648_v29 }
 0xfa6   :  { %874 = vtanh.f32 %v658_v31 }
 0xfac   :  { %v875_v32 = vpop.eup %874 }
 0xfad   :  { %661 = vrot.lane.b32.xlu0 %v875_v32, %s913_s0 }
 0xfb5   :  { %669 = vrot.lane.b32.xlu0 %v558_v59, %s913_s0 }
0x101f   :  { %v662_v33 = vpop.permute.xlu0 %661 }
0x1020   :  { %v664_v34 = vmul.f32 %v662_v33, %v647_v52 }
0x1022   :  { %666 = vrot.lane.b32.xlu1 %v664_v34, %s914_s17 }
0x1027   :  { %v670_v36 = vpop.permute.xlu0 %669 }
0x1094   :  { %v667_v37 = vpop.permute.xlu1 %666 }
0x1095   :  { %v672_v38 = vsel %vm144_vm9, %v667_v37, %v670_v36  ;;  %776 = vst.msk [vmem:[%s1154_s2 + $0x2] sm:$0x3] %vm775_vm13, %v667_v37 }
0x1096   :  { %778 = vst.msk [vmem:[%s1154_s2 + $0x2] sm:$0x3] %vm777_vm14, %v658_v31  ;;  %810 = vmatmul.msk.f32.vlgmr.msra.gmra.mxu2 %vm317_vm3, %v672_v38 }
0x1119   :  { %v693_v20 = vpop.f32.mrf.mxu2 }
0x111a   :  { %v694_v39 = vadd.f32 %v1011_v9, %v693_v20 }
0x111c   :  { %v696_v40 = vmul.f32 2.0, %v694_v39 }
0x111e   :  { %v697_v41 = vsel %vm942_vm2, %v696_v40, %v694_v39 }
0x111f   :  { %v811_v42 = vmul.f32 -1.442695, %v697_v41 }
0x1121   :  { %876 = vpow2.f32 %v811_v42 }
0x1127   :  { %v877_v43 = vpop.eup %876 }
0x1128   :  { %v701_v46 = vadd.f32 1.0, %v877_v43 }
0x112a   :  { %878 = vrcp.f32 %v701_v46  ;;  %v713_v51 = vand.u32 2147483648, %v701_v46  ;;  %v711_v54 = vand.u32 2147483647, %v701_v46  ;;  %vm707_vm3 = vweird.f32 %v701_v46 }
0x112c   :  { %v714_v9 = vor.u32 1.1754944e-38, %v713_v51  ;;  %vm712_vm1 = vcmp.eq.f32.partialorder %v711_v54, 8.507059e+37 }
0x1130   :  { %v879_v47 = vpop.eup %878 }
0x1131   :  { %v703_v49 = vmul.f32 %v879_v47, %v701_v46  ;;  %vm708_vm15 = vweird.f32 %v879_v47 }
0x1132   :  { %vm709_vm0 = vmor %vm707_vm3, %vm708_vm15 }
0x1133   :  { %v704_v50 = vsub.f32 1.0, %v703_v49 }
0x1135   :  { %v705_v53 = vmul.f32 %v879_v47, %v704_v50 }
0x1137   :  { %v706_v55 = vadd.f32 %v879_v47, %v705_v53 }
0x1139   :  { %v710_v57 = vsel %vm709_vm0, %v879_v47, %v706_v55 }
0x113a   :  { %v715_v58 = vsel %vm712_vm1, %v714_v9, %v710_v57 }
0x113b   :  { %v717_v59 = vmul.f32 2.0, %v715_v58 }
0x113d   :  { %v812_v45 = vadd.f32 -1.0, %v717_v59 }
0x113f   :  { %v719_v60 = vsel %vm942_vm2, %v812_v45, %v715_v58  ;;  %vm595_vm2 = vcmask 123968  }
0x1140   :  { %722 = vrot.lane.b32.xlu1 %v719_v60, %s913_s0  ;;  %v720_v35 = vmul.f32 %v719_v60, %v1087_v56 }
0x11b2   :  { %v723_v61 = vpop.permute.xlu1 %722 }
0x11b3   :  { %v725_v62 = vmul.f32 %v723_v61, %v719_v60 }
0x11b5   :  { %727 = vrot.lane.b32.xlu0 %v725_v62, %s914_s17 }
0x1227   :  { %v728_v63 = vpop.permute.xlu0 %727 }
0x1228   :  { %v730_v0 = vadd.f32 %v728_v63, %v720_v35 }
0x122a   :  { %880 = vtanh.f32 %v730_v0 }
0x1230   :  { %v881_v1 = vpop.eup %880 }
0x1231   :  { %733 = vrot.lane.b32.xlu2 %v881_v1, %s913_s0 }
0x128b   :  { %v734_v4 = vpop.permute.xlu2 %733 }
0x128c   :  { %v736_v5 = vmul.f32 %v734_v4, %v719_v60 }
0x128e   :  { %738 = vrot.lane.b32.xlu1 %v736_v5, %s914_s17 }
0x1296   :  { %592 = vrot.lane.b32.xlu1 %v1096_v3, %s912_s15 }
0x1300   :  { %v739_v22 = vpop.permute.xlu1 %738 }
0x1301   :  { %780 = vst.msk [vmem:[%s1154_s2 + $0x4] sm:$0x3] %vm775_vm13, %v739_v22  ;;  %813 = vmatmul.msk.f32.vlgmr.msrb.gmra.mxu3 %vm144_vm9, %v739_v22  ;;  %vm773_vm9 = vcmask 189568  }
0x1302   :  { %781 = vst.msk [vmem:[%s1154_s2 + $0x4] sm:$0x3] %vm777_vm14, %v730_v0 }
0x1308   :  { %v593_v56 = vpop.permute.xlu1 %592 }
0x1309   :  { %596 = vst.msk [vmem:[%s1154_s2] sm:$0x3] %vm595_vm2, %v593_v56 }
0x1384   :  { %v759_v3 = vpop.f32.mrf.mxu3 }
0x1385   :  { %v760_v6 = vadd.f32 %v1046_v44, %v759_v3 }
0x1387   :  { %v762_v7 = vmax.f32 %v760_v6, 0.0 }
0x1389   :  { %v763_v8 = vmul.f32 %v1049_v48, %v762_v7 }
0x138b   :  { %v764_v10 = vsel %vm411_vm11, %v763_v8, 0.0 }
0x138c   :  { %765 = vadd.xlane.f32.xlu0 %v764_v10 }
0x13ff   :  { %v766_v11 = vpop.xlane.xlu0 %765 }
0x1400   :  { %882 = vrcp.f32 %v766_v11 }
0x1406   :  { %v883_v12 = vpop.eup %882 }
0x1407   :  { %v768_v13 = vmul.f32 %v883_v12, %v762_v7 }
0x1409   :  { %770 = vrot.lane.b32.xlu1 %v768_v13, %s919_s7 }
0x147b   :  { %v771_v14 = vpop.permute.xlu1 %770 }
0x147c   :  { %774 = vst.msk [vmem:[%s1154_s2] sm:$0x3] %vm773_vm9, %v771_v14 }
0x147d   :  { %786 = vsyncpa [#allocation3], 1 }

</bundles_post_ra>
